<compile_context>
chip_gen: v5e
topology: v5e:2x2
jax: 0.10.0
libtpu: 0.0.40
codegen_flags: <defaults>
</compile_context>

<pallas_src>
import math
from functools import partial

import numpy as np
import jax
import jax.numpy as jnp
from jax import lax
from jax.experimental import pallas as pl
from jax.experimental.pallas import tpu as pltpu

# ---- module hyper-parameters (consistent with the PyTorch __init__) ----
EMBED_DIM = 128          # input_channels
NUM_CLASSES = 8          # ClassPredictor.num_classes
LOGIT_PAD = 128          # lane-dense MXU width for the class matmul (VMEM-internal only)
MIN_SIZE = 50.0          # min_proposal_size
LEVEL_STRIDES = (16,)    # single level -> no enc_output_proj convs (Identity)
TOP_K_TEST = 32
PRIOR_PROB = 0.01
CLS_BIAS = -math.log((1.0 - PRIOR_PROB) / PRIOR_PROB)
NUM_QUERY_EMBED = 1200
TILE_MAX = 1024          # rows per grid step (raised from 512 per review)
ROW_ALIGN = 16           # bf16 sublane quantum; also fine for f32 blocks
LN_EPS = 1e-5


def _round_up(x, m):
    return ((x + m - 1) // m) * m


# ----------------------------------------------------------------------------
# Pallas kernel: masked memory -> Linear(C,C) -> LayerNorm -> class logits.
# One (TILE, C) row-block of the flattened (B*S padded, C) slab per grid step.
# bf16 MXU operands, f32 accumulation / LayerNorm; bf16 memory store + 8-wide f32 logit store.
# ----------------------------------------------------------------------------
def _encoder_proposals_kernel(mem_ref,        # (TILE, C)          f32
                              bad_ref,        # (TILE, 1)          f32, 1.0 = padded/invalid
                              enc_w_ref,      # (C, C)             bf16
                              enc_b_ref,      # (1, C)             f32
                              ln_g_ref,       # (1, C)             f32
                              ln_b_ref,       # (1, C)             f32
                              cls_w_ref,      # (C, LOGIT_PAD)     bf16 (zero-padded cols)
                              cls_b_ref,      # (1, LOGIT_PAD)     f32  (zero-padded cols)
                              out_mem_ref,    # (TILE, C)          bf16
                              out_logit_ref): # (TILE, NUM_CLASSES) f32
    x = mem_ref[...]
    bad = bad_ref[...]
    xm = jnp.where(bad > 0.5, 0.0, x)

    # enc_output Linear (MXU, bf16 operands, f32 accumulate)
    h = jnp.dot(xm.astype(jnp.bfloat16), enc_w_ref[...],
                preferred_element_type=jnp.float32) + enc_b_ref[0]

    # LayerNorm with single-pass statistics: var = E[h^2] - mu^2 (clamped for safety).
    mu = jnp.mean(h, axis=-1, keepdims=True)
    ex2 = jnp.mean(h * h, axis=-1, keepdims=True)
    var = jnp.maximum(ex2 - mu * mu, 0.0)
    hn = (h - mu) * lax.rsqrt(var + LN_EPS)
    hn = hn * ln_g_ref[0] + ln_b_ref[0]
    out_mem_ref[...] = hn.astype(out_mem_ref.dtype)          # bf16 store (halves write bytes)

    # ClassPredictor logits: lane-dense 128-wide matmul in VMEM, but only the real
    # NUM_CLASSES columns go to HBM (block last dim == full array dim).
    logits = jnp.dot(hn.astype(jnp.bfloat16), cls_w_ref[...],
                     preferred_element_type=jnp.float32) + cls_b_ref[0]
    out_logit_ref[...] = logits[:, :NUM_CLASSES]


# ----------------------------------------------------------------------------
# Proposal grid + pad/validity mask (plain JAX; trivially cheap and fully fusible)
# ----------------------------------------------------------------------------
def _proposal_grid_and_badmask(padding_mask, spatial_shape):
    B, S = padding_mask.shape
    H, W = spatial_shape
    stride = float(LEVEL_STRIDES[0])

    mask_hw = padding_mask.reshape(B, H, W)
    valid_H = jnp.sum(~mask_hw[:, :, 0], axis=1).astype(jnp.float32) * stride
    valid_W = jnp.sum(~mask_hw[:, 0, :], axis=1).astype(jnp.float32) * stride

    idx = jnp.arange(S, dtype=jnp.int32)
    gy = (idx // W).astype(jnp.float32)
    gx = (idx % W).astype(jnp.float32)
    cx = (gx + 0.5) * stride
    cy = (gy + 0.5) * stride
    wh = jnp.full_like(cx, MIN_SIZE)       # min_size * 2**(lvl - start_level), lvl == 0
    prop = jnp.broadcast_to(jnp.stack([cx, cy, wh, wh], axis=-1)[None], (B, S, 4))

    img = jnp.stack([valid_W, valid_H, valid_W, valid_H], axis=-1)[:, None, :]   # (B,1,4)
    valid = jnp.all((prop > 0.01 * img) & (prop < 0.99 * img), axis=-1, keepdims=True)
    bad = padding_mask[..., None] | ~valid                                        # (B,S,1)

    # TODO(synk): deformable-DETR masked_fills proposals with +inf; finite fill keeps the
    # downstream sin/cos box encoder NaN-free while preserving "invalid rows never win top-k
    # on geometry" semantics used here.
    fill = float(max(H, W)) * stride
    prop_out = jnp.where(bad, fill, prop)
    return prop_out, bad


# ----------------------------------------------------------------------------
# Parameter preparation (one-time, OUTSIDE the per-call jit): bf16 weights,
# lane-padded class weight/bias for the 128-wide MXU matmul.
# ----------------------------------------------------------------------------
def prepare_params(params):
    C = EMBED_DIM
    cls_w_pad = jnp.zeros((C, LOGIT_PAD), jnp.float32).at[:, :NUM_CLASSES].set(
        params["cls_w"])
    cls_b_pad = jnp.zeros((1, LOGIT_PAD), jnp.float32).at[:, :NUM_CLASSES].set(
        params["cls_b"])
    return {
        "query_embed": params["query_embed"],
        "enc_w_bf16": params["enc_w"].astype(jnp.bfloat16),
        "enc_b": params["enc_b"],
        "ln_g": params["ln_g"],
        "ln_b": params["ln_b"],
        "cls_w_pad_bf16": cls_w_pad.astype(jnp.bfloat16),
        "cls_b_pad": cls_b_pad,
    }


# ----------------------------------------------------------------------------
# gen_encoder_output_proposals + ClassPredictor (kernel wrapper)
# ----------------------------------------------------------------------------
def gen_encoder_output_proposals(memory, padding_mask, spatial_shape, prepared):
    B, S, C = memory.shape
    assert C == EMBED_DIM

    proposal_boxes, bad = _proposal_grid_and_badmask(padding_mask, spatial_shape)
    bad_f = bad.astype(jnp.float32)

    # Flatten rows (computation is purely per-row); pad so the row count tiles evenly.
    # Tile is capped at ceil(N/2) so the grid has >= 2 steps whenever there is enough work
    # (keeps both v7x TensorCores busy via the "parallel" axis), and aligned to 16 rows
    # (bf16 sublane quantum for the bf16 output block).
    N_raw = B * S
    tile = min(TILE_MAX, _round_up(max((N_raw + 1) // 2, ROW_ALIGN), ROW_ALIGN))
    N = _round_up(N_raw, tile)
    mem2 = memory.reshape(N_raw, C)
    bad2 = bad_f.reshape(N_raw, 1)
    if N != N_raw:
        mem2 = jnp.pad(mem2, ((0, N - N_raw), (0, 0)))
        bad2 = jnp.pad(bad2, ((0, N - N_raw), (0, 0)), constant_values=1.0)

    const = lambda shape: pl.BlockSpec(shape, lambda i: (0, 0))
    row = lambda last: pl.BlockSpec((tile, last), lambda i: (i, 0))

    cost = pl.CostEstimate(
        flops=2 * N * C * (C + LOGIT_PAD) + 10 * N * C,
        transcendentals=N,
        bytes_accessed=(N * (C * 4 + 4)                       # reads: f32 memory + bad mask
                        + N * (C * 2 + NUM_CLASSES * 4)       # writes: bf16 memory + f32 logits
                        + C * C * 2 + C * LOGIT_PAD * 2       # bf16 weights
                        + 4 * C * 4 + LOGIT_PAD * 4),         # biases / LN params
    )

    out_mem, out_logits = pl.pallas_call(
        _encoder_proposals_kernel,
        out_shape=(
            jax.ShapeDtypeStruct((N, C), jnp.bfloat16),
            jax.ShapeDtypeStruct((N, NUM_CLASSES), jnp.float32),
        ),
        grid_spec=pltpu.PrefetchScalarGridSpec(
            num_scalar_prefetch=0,
            grid=(N // tile,),
            in_specs=[
                row(C),                    # memory rows (f32)
                row(1),                    # bad mask rows (f32)
                const((C, C)),             # enc_output weight (bf16)
                const((1, C)),             # enc_output bias
                const((1, C)),             # layernorm gamma
                const((1, C)),             # layernorm beta
                const((C, LOGIT_PAD)),     # class weight (bf16, lane-padded in VMEM only)
                const((1, LOGIT_PAD)),     # class bias (lane-padded)
            ],
            out_specs=(row(C), row(NUM_CLASSES)),
        ),
        compiler_params=pltpu.CompilerParams(
            dimension_semantics=("parallel",)),
        cost_estimate=cost,
    )(mem2, bad2, prepared["enc_w_bf16"], prepared["enc_b"], prepared["ln_g"],
      prepared["ln_b"], prepared["cls_w_pad_bf16"], prepared["cls_b_pad"])

    out_mem = out_mem[:N_raw].reshape(B, S, C)                     # bf16
    pred_logits = out_logits[:N_raw].reshape(B, S, NUM_CLASSES)    # f32
    return out_mem, proposal_boxes, pred_logits


# ----------------------------------------------------------------------------
# get_proposals: kernel + top-k selection (glue, plain JAX)
# ----------------------------------------------------------------------------
def get_proposals(memory, padding_mask, spatial_shape, prepared):
    out_mem, proposal_boxes, pred_logits = gen_encoder_output_proposals(
        memory, padding_mask, spatial_shape, prepared)
    scores = pred_logits[..., 0]                                  # (B, S)
    k = min(TOP_K_TEST, scores.shape[1])
    _, topk_idx = lax.top_k(scores, k)                            # (B, k)
    topk_boxes = jnp.take_along_axis(proposal_boxes, topk_idx[..., None], axis=1)
    topk_logits = jnp.take_along_axis(pred_logits, topk_idx[..., None], axis=1)
    encoder_proposals = {"proposal_boxes": proposal_boxes, "pred_logits": pred_logits,
                         "output_memory": out_mem}
    # TODO(synk): no box-regression Predictor is defined in the provided source, so the
    # top-k instances carry the (gathered) proposal boxes as pred_boxes.
    pred_instances = {"pred_boxes": topk_boxes, "pred_logits": topk_logits}
    return encoder_proposals, pred_instances


def box_2d_encoder_stub(boxes, embed_dim):
    # TODO(synk): `self.encoders.box_2d_encoder` is external / not defined in the provided
    # module; deterministic sinusoidal stand-in with the same (B, K, embed_dim) output shape.
    B, K, _ = boxes.shape
    n_freq = embed_dim // 8
    freqs = (2.0 ** jnp.arange(n_freq, dtype=jnp.float32)) * (math.pi / 512.0)
    ang = boxes[..., None] * freqs                                # (B, K, 4, n_freq)
    pe = jnp.concatenate([jnp.sin(ang), jnp.cos(ang)], axis=-1)   # (B, K, 4, 2*n_freq)
    return pe.reshape(B, K, embed_dim)


@partial(jax.jit, static_argnames=("spatial_shape",))
def encoder_proposals_forward(src_flatten, mask_flatten, spatial_shape, prepared):
    encoder_proposals, pred_instances = get_proposals(
        src_flatten, mask_flatten, spatial_shape, prepared)
    box_2d_pos_embed = box_2d_encoder_stub(
        lax.stop_gradient(pred_instances["pred_boxes"]), EMBED_DIM)
    batch_size, number_queries, _ = box_2d_pos_embed.shape
    box_2d_queries = jnp.broadcast_to(
        prepared["query_embed"][None, :number_queries],
        (batch_size, number_queries, EMBED_DIM))
    self_attn_mask = jnp.zeros((number_queries, number_queries), dtype=jnp.bool_)
    return {
        "query": box_2d_queries,
        "pos_embed": box_2d_pos_embed,
        "self_attn_mask": self_attn_mask,
        "encoder_proposals": encoder_proposals,
        "encoder_preds": pred_instances,
        "num_one2one": TOP_K_TEST,
    }


# ----------------------------------------------------------------------------
# Pure-JAX reference of the kernel-covered math (same bf16-MXU / f32-LN recipe)
# ----------------------------------------------------------------------------
def _reference(memory, padding_mask, spatial_shape, params):
    B, S, C = memory.shape
    H, W = spatial_shape
    stride = float(LEVEL_STRIDES[0])
    ys, xs = jnp.meshgrid(jnp.arange(H, dtype=jnp.float32),
                          jnp.arange(W, dtype=jnp.float32), indexing="ij")
    grid = (jnp.stack([xs, ys], axis=-1)[None] + 0.5) * stride
    wh = jnp.full_like(grid, MIN_SIZE)
    prop = jnp.broadcast_to(jnp.concatenate([grid, wh], -1).reshape(1, S, 4), (B, S, 4))
    mask_hw = padding_mask.reshape(B, H, W)
    valid_H = jnp.sum(~mask_hw[:, :, 0], 1).astype(jnp.float32) * stride
    valid_W = jnp.sum(~mask_hw[:, 0, :], 1).astype(jnp.float32) * stride
    img_size = jnp.stack([valid_W, valid_H, valid_W, valid_H], -1)[:, None]
    valid = jnp.all((prop > 0.01 * img_size) & (prop < 0.99 * img_size), -1, keepdims=True)
    fill = float(max(H, W)) * stride
    bad = padding_mask.reshape(B, S, 1) | ~valid
    prop_out = jnp.where(bad, fill, prop)
    mem = jnp.where(bad, 0.0, memory)
    h = jnp.dot(mem.astype(jnp.bfloat16), params["enc_w"].astype(jnp.bfloat16),
                preferred_element_type=jnp.float32) + params["enc_b"][0]
    mu = h.mean(-1, keepdims=True)
    var = ((h - mu) ** 2).mean(-1, keepdims=True)
    hn = (h - mu) / jnp.sqrt(var + LN_EPS) * params["ln_g"][0] + params["ln_b"][0]
    logits = jnp.dot(hn.astype(jnp.bfloat16), params["cls_w"].astype(jnp.bfloat16),
                     preferred_element_type=jnp.float32) + params["cls_b"][0]
    return hn, prop_out, logits


# ----------------------------------------------------------------------------
def init_params(key):
    k1, k2, k3 = jax.random.split(key, 3)
    C = EMBED_DIM
    return {
        "query_embed": jax.random.normal(k1, (NUM_QUERY_EMBED, C), jnp.float32),
        "enc_w": 0.02 * jax.random.normal(k2, (C, C), jnp.float32),
        "enc_b": jnp.zeros((1, C), jnp.float32),
        "ln_g": jnp.ones((1, C), jnp.float32),
        "ln_b": jnp.zeros((1, C), jnp.float32),
        "cls_w": 0.02 * jax.random.normal(k3, (C, NUM_CLASSES), jnp.float32),
        "cls_b": jnp.full((1, NUM_CLASSES), CLS_BIAS, jnp.float32),
    }


if __name__ == "__main__":
    key = jax.random.PRNGKey(0)
    pkey, mkey = jax.random.split(key)
    params = init_params(pkey)
    prepared = prepare_params(params)          # one-time bf16 cast / lane padding

    B, H, W = 2, 16, 16
    S = H * W
    src_flatten = jax.random.normal(mkey, (B, S, EMBED_DIM), jnp.float32)

    # padding mask: batch 0 fully valid; batch 1 padded for rows >= 14 or cols >= 12
    rows = jnp.arange(H)[:, None]
    cols = jnp.arange(W)[None, :]
    mask1 = (rows >= 14) | (cols >= 12)
    mask_flatten = jnp.stack(
        [jnp.zeros((H, W), jnp.bool_), mask1], axis=0).reshape(B, S)

    out = encoder_proposals_forward(src_flatten, mask_flatten, (H, W), prepared)
    jax.block_until_ready(out["query"])
    jax.block_until_ready(out["pos_embed"])
    jax.block_until_ready(out["encoder_proposals"]["pred_logits"])

    # correctness check of the kernel-covered math against a pure-JAX reference
    ref_mem, ref_prop, ref_logits = _reference(src_flatten, mask_flatten, (H, W), params)
    ep = out["encoder_proposals"]
    np.testing.assert_allclose(
        np.asarray(ep["output_memory"].astype(jnp.float32)), np.asarray(ref_mem),
        rtol=2e-2, atol=2e-2)
    np.testing.assert_allclose(np.asarray(ep["proposal_boxes"]), np.asarray(ref_prop),
                               rtol=1e-5, atol=1e-5)
    np.testing.assert_allclose(np.asarray(ep["pred_logits"]), np.asarray(ref_logits),
                               rtol=2e-2, atol=2e-2)

    assert out["query"].shape == (B, TOP_K_TEST, EMBED_DIM)
    assert out["pos_embed"].shape == (B, TOP_K_TEST, EMBED_DIM)
    assert out["self_attn_mask"].shape == (TOP_K_TEST, TOP_K_TEST)
    print("KERNEL_OK")
</pallas_src>

<mosaic_0001>
module attributes {stable_mosaic.version = 11 : i64} {
  func.func @_encoder_proposals_kernel(%arg0: i32, %arg1: memref<256x128xf32, #tpu.memory_space<vmem>>, %arg2: memref<256x1xf32, #tpu.memory_space<vmem>>, %arg3: memref<128x128xbf16, #tpu.memory_space<vmem>>, %arg4: memref<1x128xf32, #tpu.memory_space<vmem>>, %arg5: memref<1x128xf32, #tpu.memory_space<vmem>>, %arg6: memref<1x128xf32, #tpu.memory_space<vmem>>, %arg7: memref<128x128xbf16, #tpu.memory_space<vmem>>, %arg8: memref<1x128xf32, #tpu.memory_space<vmem>>, %arg9: memref<256x128xbf16, #tpu.memory_space<vmem>>, %arg10: memref<256x8xf32, #tpu.memory_space<vmem>>) attributes {dimension_semantics = [#tpu.dimension_semantics<parallel>], iteration_bounds = array<i64: 2>, scalar_prefetch = 0 : i64, scratch_operands = 0 : i64, tpu.core_type = #tpu.core_type<tc>, window_params = [{transform_indices = @transform_0, window_bounds = array<i64: 256, 128>}, {transform_indices = @transform_1, window_bounds = array<i64: 256, 1>}, {pipeline_mode = #tpu.pipeline_mode<synchronous>, transform_indices = @transform_2, window_bounds = array<i64: 128, 128>}, {pipeline_mode = #tpu.pipeline_mode<synchronous>, transform_indices = @transform_3, window_bounds = array<i64: 1, 128>}, {pipeline_mode = #tpu.pipeline_mode<synchronous>, transform_indices = @transform_4, window_bounds = array<i64: 1, 128>}, {pipeline_mode = #tpu.pipeline_mode<synchronous>, transform_indices = @transform_5, window_bounds = array<i64: 1, 128>}, {pipeline_mode = #tpu.pipeline_mode<synchronous>, transform_indices = @transform_6, window_bounds = array<i64: 128, 128>}, {pipeline_mode = #tpu.pipeline_mode<synchronous>, transform_indices = @transform_7, window_bounds = array<i64: 1, 128>}, {transform_indices = @transform_8, window_bounds = array<i64: 256, 128>}, {transform_indices = @transform_9, window_bounds = array<i64: 256, 8>}]} {
    %c0 = arith.constant 0 : index
    %c0_0 = arith.constant 0 : index
    %0 = vector.load %arg1[%c0, %c0_0] : memref<256x128xf32, #tpu.memory_space<vmem>>, vector<256x128xf32>
    %c0_1 = arith.constant 0 : index
    %c0_2 = arith.constant 0 : index
    %1 = vector.load %arg2[%c0_1, %c0_2] : memref<256x1xf32, #tpu.memory_space<vmem>>, vector<256x1xf32>
    %cst = arith.constant 5.000000e-01 : f32
    %2 = vector.broadcast %cst : f32 to vector<256x1xf32>
    %3 = arith.cmpf ogt, %1, %2 : vector<256x1xf32>
    %cst_3 = arith.constant 0.000000e+00 : f32
    %4 = vector.shape_cast %3 : vector<256x1xi1> to vector<256x1xi1>
    %5 = vector.broadcast %4 : vector<256x1xi1> to vector<256x128xi1>
    %6 = vector.broadcast %cst_3 : f32 to vector<256x128xf32>
    %7 = arith.select %5, %6, %0 : vector<256x128xi1>, vector<256x128xf32>
    %8 = arith.truncf %7 : vector<256x128xf32> to vector<256x128xbf16>
    %c0_4 = arith.constant 0 : index
    %c0_5 = arith.constant 0 : index
    %9 = vector.load %arg3[%c0_4, %c0_5] : memref<128x128xbf16, #tpu.memory_space<vmem>>, vector<128x128xbf16>
    %cst_6 = arith.constant dense<0.000000e+00> : vector<256x128xf32>
    %10 = tpu.matmul %8, %9, %cst_6 {dimension_numbers = #tpu.dot_dimension_numbers<[1], [0], [0], [1], [0, 0, 1, 1], [], []>} : vector<256x128xbf16>, vector<128x128xbf16>, vector<256x128xf32> -> vector<256x128xf32>
    %c0_7 = arith.constant 0 : index
    %c0_8 = arith.constant 0 : index
    %11 = vector.load %arg4[%c0_7, %c0_8] : memref<1x128xf32, #tpu.memory_space<vmem>>, vector<1x128xf32>
    %12 = vector.shape_cast %11 : vector<1x128xf32> to vector<128xf32>
    %13 = vector.shape_cast %12 : vector<128xf32> to vector<1x128xf32>
    %14 = vector.broadcast %13 : vector<1x128xf32> to vector<256x128xf32>
    %15 = arith.addf %10, %14 : vector<256x128xf32>
    %cst_9 = arith.constant dense<0.000000e+00> : vector<256xf32>
    %16 = vector.multi_reduction <add>, %15, %cst_9 [1] : vector<256x128xf32> to vector<256xf32>
    %17 = vector.shape_cast %16 : vector<256xf32> to vector<256x1xf32>
    %cst_10 = arith.constant 1.280000e+02 : f32
    %18 = vector.broadcast %cst_10 : f32 to vector<256x1xf32>
    %19 = arith.divf %17, %18 : vector<256x1xf32>
    %20 = arith.mulf %15, %15 : vector<256x128xf32>
    %cst_11 = arith.constant dense<0.000000e+00> : vector<256xf32>
    %21 = vector.multi_reduction <add>, %20, %cst_11 [1] : vector<256x128xf32> to vector<256xf32>
    %22 = vector.shape_cast %21 : vector<256xf32> to vector<256x1xf32>
    %cst_12 = arith.constant 1.280000e+02 : f32
    %23 = vector.broadcast %cst_12 : f32 to vector<256x1xf32>
    %24 = arith.divf %22, %23 : vector<256x1xf32>
    %25 = arith.mulf %19, %19 : vector<256x1xf32>
    %26 = arith.subf %24, %25 : vector<256x1xf32>
    %cst_13 = arith.constant 0.000000e+00 : f32
    %27 = vector.broadcast %cst_13 : f32 to vector<256x1xf32>
    %28 = arith.maximumf %26, %27 : vector<256x1xf32>
    %29 = vector.broadcast %19 : vector<256x1xf32> to vector<256x128xf32>
    %30 = arith.subf %15, %29 : vector<256x128xf32>
    %cst_14 = arith.constant 9.99999974E-6 : f32
    %31 = vector.broadcast %cst_14 : f32 to vector<256x1xf32>
    %32 = arith.addf %28, %31 : vector<256x1xf32>
    %33 = math.rsqrt %32 : vector<256x1xf32>
    %34 = vector.broadcast %33 : vector<256x1xf32> to vector<256x128xf32>
    %35 = arith.mulf %30, %34 : vector<256x128xf32>
    %c0_15 = arith.constant 0 : index
    %c0_16 = arith.constant 0 : index
    %36 = vector.load %arg5[%c0_15, %c0_16] : memref<1x128xf32, #tpu.memory_space<vmem>>, vector<1x128xf32>
    %37 = vector.shape_cast %36 : vector<1x128xf32> to vector<128xf32>
    %38 = vector.shape_cast %37 : vector<128xf32> to vector<1x128xf32>
    %39 = vector.broadcast %38 : vector<1x128xf32> to vector<256x128xf32>
    %40 = arith.mulf %35, %39 : vector<256x128xf32>
    %c0_17 = arith.constant 0 : index
    %c0_18 = arith.constant 0 : index
    %41 = vector.load %arg6[%c0_17, %c0_18] : memref<1x128xf32, #tpu.memory_space<vmem>>, vector<1x128xf32>
    %42 = vector.shape_cast %41 : vector<1x128xf32> to vector<128xf32>
    %43 = vector.shape_cast %42 : vector<128xf32> to vector<1x128xf32>
    %44 = vector.broadcast %43 : vector<1x128xf32> to vector<256x128xf32>
    %45 = arith.addf %40, %44 : vector<256x128xf32>
    %46 = arith.truncf %45 : vector<256x128xf32> to vector<256x128xbf16>
    %c0_19 = arith.constant 0 : index
    %c0_20 = arith.constant 0 : index
    %47 = vector.load %arg9[%c0_19, %c0_20] : memref<256x128xbf16, #tpu.memory_space<vmem>>, vector<256x128xbf16>
    tpu.vector_store %arg9[%c0_19, %c0_20], %46 {strides = array<i32>} : memref<256x128xbf16, #tpu.memory_space<vmem>>, vector<256x128xbf16>,
    %48 = arith.truncf %45 : vector<256x128xf32> to vector<256x128xbf16>
    %c0_21 = arith.constant 0 : index
    %c0_22 = arith.constant 0 : index
    %49 = vector.load %arg7[%c0_21, %c0_22] : memref<128x128xbf16, #tpu.memory_space<vmem>>, vector<128x128xbf16>
    %cst_23 = arith.constant dense<0.000000e+00> : vector<256x128xf32>
    %50 = tpu.matmul %48, %49, %cst_23 {dimension_numbers = #tpu.dot_dimension_numbers<[1], [0], [0], [1], [0, 0, 1, 1], [], []>} : vector<256x128xbf16>, vector<128x128xbf16>, vector<256x128xf32> -> vector<256x128xf32>
    %c0_24 = arith.constant 0 : index
    %c0_25 = arith.constant 0 : index
    %51 = vector.load %arg8[%c0_24, %c0_25] : memref<1x128xf32, #tpu.memory_space<vmem>>, vector<1x128xf32>
    %52 = vector.shape_cast %51 : vector<1x128xf32> to vector<128xf32>
    %53 = vector.shape_cast %52 : vector<128xf32> to vector<1x128xf32>
    %54 = vector.broadcast %53 : vector<1x128xf32> to vector<256x128xf32>
    %55 = arith.addf %50, %54 : vector<256x128xf32>
    %56 = vector.extract_strided_slice %55 {offsets = [0, 0], sizes = [256, 8], strides = [1, 1]} : vector<256x128xf32> to vector<256x8xf32>
    %c0_26 = arith.constant 0 : index
    %c0_27 = arith.constant 0 : index
    %57 = vector.load %arg10[%c0_26, %c0_27] : memref<256x8xf32, #tpu.memory_space<vmem>>, vector<256x8xf32>
    tpu.vector_store %arg10[%c0_26, %c0_27], %56 {strides = array<i32>} : memref<256x8xf32, #tpu.memory_space<vmem>>, vector<256x8xf32>,
    return
  }
  func.func @transform_0(%arg0: i32) -> (i32, i32) {
    %c0_i32 = arith.constant 0 : i32
    %c0_i32_0 = arith.constant 0 : i32
    return %arg0, %c0_i32 : i32, i32
  }
  func.func @transform_1(%arg0: i32) -> (i32, i32) {
    %c0_i32 = arith.constant 0 : i32
    %c0_i32_0 = arith.constant 0 : i32
    return %arg0, %c0_i32 : i32, i32
  }
  func.func @transform_2(%arg0: i32) -> (i32, i32) {
    %c0_i32 = arith.constant 0 : i32
    %c0_i32_0 = arith.constant 0 : i32
    %c0_i32_1 = arith.constant 0 : i32
    return %c0_i32, %c0_i32_0 : i32, i32
  }
  func.func @transform_3(%arg0: i32) -> (i32, i32) {
    %c0_i32 = arith.constant 0 : i32
    %c0_i32_0 = arith.constant 0 : i32
    %c0_i32_1 = arith.constant 0 : i32
    return %c0_i32, %c0_i32_0 : i32, i32
  }
  func.func @transform_4(%arg0: i32) -> (i32, i32) {
    %c0_i32 = arith.constant 0 : i32
    %c0_i32_0 = arith.constant 0 : i32
    %c0_i32_1 = arith.constant 0 : i32
    return %c0_i32, %c0_i32_0 : i32, i32
  }
  func.func @transform_5(%arg0: i32) -> (i32, i32) {
    %c0_i32 = arith.constant 0 : i32
    %c0_i32_0 = arith.constant 0 : i32
    %c0_i32_1 = arith.constant 0 : i32
    return %c0_i32, %c0_i32_0 : i32, i32
  }
  func.func @transform_6(%arg0: i32) -> (i32, i32) {
    %c0_i32 = arith.constant 0 : i32
    %c0_i32_0 = arith.constant 0 : i32
    %c0_i32_1 = arith.constant 0 : i32
    return %c0_i32, %c0_i32_0 : i32, i32
  }
  func.func @transform_7(%arg0: i32) -> (i32, i32) {
    %c0_i32 = arith.constant 0 : i32
    %c0_i32_0 = arith.constant 0 : i32
    %c0_i32_1 = arith.constant 0 : i32
    return %c0_i32, %c0_i32_0 : i32, i32
  }
  func.func @transform_8(%arg0: i32) -> (i32, i32) {
    %c0_i32 = arith.constant 0 : i32
    %c0_i32_0 = arith.constant 0 : i32
    return %arg0, %c0_i32 : i32, i32
  }
  func.func @transform_9(%arg0: i32) -> (i32, i32) {
    %c0_i32 = arith.constant 0 : i32
    %c0_i32_0 = arith.constant 0 : i32
    return %arg0, %c0_i32 : i32, i32
  }
}

</mosaic_0001>

<bundles_post_ra>
// kernel: encoder_proposals_forward.1
= control target key start
LH: loop header
LB: loop body
LE: loop exit
PB: predicated region body
PF: predicated region fallthrough
CT: control target
= control target key end

     0   :  { %15 = vsyncpa [#allocation3], 0  ;;  %s4230_s0 = inlined_call_operand.vmem [shape: f32[512,128], index: 0, kind: input, shape index: {}]   ;;  %s4231_s1 = inlined_call_operand.vmem [shape: f32[512,1], index: 1, kind: input, shape index: {}]   ;;  %s4232_s2 = inlined_call_operand.vmem [shape: bf16[128,128], index: 2, kind: input, shape index: {}]   ;;  %s4233_s3 = inlined_call_operand.vmem [shape: f32[1,128], index: 3, kind: input, shape index: {}]   ;;  %s4234_s4 = inlined_call_operand.vmem [shape: f32[1,128], index: 4, kind: input, shape index: {}]   ;;  %s4235_s5 = inlined_call_operand.vmem [shape: f32[1,128], index: 5, kind: input, shape index: {}]   ;;  %s4236_s6 = inlined_call_operand.vmem [shape: bf16[128,128], index: 6, kind: input, shape index: {}]   ;;  %s4237_s7 = inlined_call_operand.vmem [shape: f32[1,128], index: 7, kind: input, shape index: {}]   ;;  %s4238_s8 = inlined_call_operand.hbm [shape: bf16[512,128], index: 8, kind: output, shape index: {0}]   ;;  %s4239_s9 = inlined_call_operand.vmem [shape: f32[512,8], index: 9, kind: output, shape index: {1}]  }
   0x1   :  { %17 = vsyncpa [#allocation3 + $0x1], 0  ;;  %s2676_s30 = smov 0   ;;  %s2678_s10 = smov 0  }
   0x2   :  { %s2680_s11 = smov 0   ;;  %s2682_s12 = smov 0  }
   0x3 LB: > { %s2697_s13 = sadd.s32 4294967295, %s2620_s12   ;;  %s2120_s14 = sadd.s32 4294967294, %s2620_s12   ;;  %s2620_s12 = sphi %s2682_s12, %s4304_s12   ;;  %s2616_s11 = sphi %s2680_s11, %s4303_s11   ;;  %s2612_s10 = sphi %s2678_s10, %s4302_s10   ;;  %s2608_s30 = sphi %s2676_s30, %s4301_s30  }
   0x4   : > { %s2701_s15 = sadd.s32 1, %s2620_s12   ;;  %s208_s16 = sadd.s32 1, %s2616_s11 }
   0x5   : > { %s205_s17 = ssub.s32 %s2620_s12, %s2701_s15  ;;  %p218_p0 = scmp.ne.s32.totalorder %s2616_s11, %s2612_s10 }
   0x6   : > { %p206_p1 = scmp.eq.s32.totalorder %s205_s17, 0  ;;  %p219_p2 = scmp.eq.s32.totalorder %s2697_s13, 1 }
   0x7   : > { %p224_p3 = scmp.ne.s32.totalorder %s2612_s10, %s2608_s30  ;;  %p225_p4 = scmp.eq.s32.totalorder %s2120_s14, 1 }
   0x8   : > { %s2712_s18 = scalar_select %p206_p1, %s2616_s11, %s208_s16  }
   0x9   : > { %p2714_p5 = por %p219_p2, %p218_p0  ;;  %p2718_p6 = por %p225_p4, %p224_p3 }
   0xa   : > { %p2123_p7 = scmp.ge.s32.totalorder %s2620_s12, 1  ;;  %p305_p8 = scmp.lt.s32.totalorder %s2620_s12, 3 }
   0xc   : > { %p306_p9 = pnand %p2123_p7, %p305_p8 }
   0xe   : > { %309 = sbr.rel (%p306_p9) target bundleno = 756 (0x2f4), region = 52 }
  0x13   : > { %s2125_s21 = sshll.u32 %s2697_s13, 5  ;;  %v2622_v0 = vmov 0   ;;  %s341_s23 = sand.u32 1, %s2612_s10  }
  0x14   : > { %2485 = vset.pattern.permute.xlu2 %v2622_v0  ;;  %2484 = vset.pattern.permute.xlu1 %v2622_v0  ;;  %p352_p10 = scmp.lt.s32.totalorder %s2125_s21, 63  ;;  %s2124_s24 = sshll.u32 %s341_s23, 7 }
  0x15   : > { %2483 = vset.pattern.permute.xlu0 %v2622_v0  ;;  %s1997_s16 = scalar_lea.sflag [#allocation3], %s341_s23 }
  0x16   : > { %s4306_s21 = smov (!%p352_p10, %s2125_s21), 63 }
  0x17   : > { %s2728_s22 = sshll.u32 %s4306_s21, 3 }
  0x18   : > { %s2734_s25 = scalar_lea.vmem %s4231_s1, %s2728_s22  ;;  %s2831_s21 = scalar_lea.vmem %s4230_s0, %s2728_s22 }
  0x19   : > { %v420_v1 = vld [vmem:[%s2734_s25 + $0x90] sm:$0xff]  ;;  %v418_v2 = vld [vmem:[%s2734_s25 + $0x80] sm:$0xff]  ;;  %v421_v7 = vld [vmem:[%s2734_s25 + $0x98] sm:$0xff] }
  0x1a   : > { %v402_v3 = vld [vmem:[%s2734_s25] sm:$0xff]  ;;  %vm452_vm0 = vcmp.gt.f32.partialorder %v420_v1, 0.5  ;;  %vm450_vm1 = vcmp.gt.f32.partialorder %v418_v2, 0.5  ;;  %v419_v8 = vld [vmem:[%s2734_s25 + $0x88] sm:$0xff]  ;;  %vm453_vm3 = vcmp.gt.f32.partialorder %v421_v7, 0.5  ;;  %v404_v14 = vld [vmem:[%s2734_s25 + $0x10] sm:$0xff] }
  0x1b   : > { %vm434_vm2 = vcmp.gt.f32.partialorder %v402_v3, 0.5  ;;  %v484_v4 = vsel %vm452_vm0, 1, %v2622_v0  ;;  %v482_v5 = vsel %vm450_vm1, 1, %v2622_v0  ;;  %v403_v9 = vld [vmem:[%s2734_s25 + $0x8] sm:$0xff]  ;;  %vm451_vm4 = vcmp.gt.f32.partialorder %v419_v8, 0.5  ;;  %v422_v13 = vld [vmem:[%s2734_s25 + $0xa0] sm:$0xff] }
  0x1c   : > { %v466_v6 = vsel %vm434_vm2, 1, %v2622_v0  ;;  %553 = vperm.xlu2 %2485, %v484_v4   ;;  %547 = vperm.xlu0 %2483, %v482_v5   ;;  %vm435_vm5 = vcmp.gt.f32.partialorder %v403_v9, 0.5  ;;  %v485_v10 = vsel %vm453_vm3, 1, %v2622_v0  ;;  %v483_v11 = vsel %vm451_vm4, 1, %v2622_v0  ;;  %v405_v15 = vld [vmem:[%s2734_s25 + $0x18] sm:$0xff]  ;;  %v407_v19 = vld [vmem:[%s2734_s25 + $0x28] sm:$0xff] }
  0x1d   : > { %499 = vperm.xlu1 %2484, %v466_v6   ;;  %v467_v12 = vsel %vm435_vm5, 1, %v2622_v0  ;;  %vm454_vm6 = vcmp.gt.f32.partialorder %v422_v13, 0.5  ;;  %vm436_vm7 = vcmp.gt.f32.partialorder %v404_v14, 0.5  ;;  %vm437_vm8 = vcmp.gt.f32.partialorder %v405_v15, 0.5  ;;  %v423_v20 = vld [vmem:[%s2734_s25 + $0xa8] sm:$0xff]  ;;  %v406_v21 = vld [vmem:[%s2734_s25 + $0x20] sm:$0xff] }
  0x1e   : > { %v486_v16 = vsel %vm454_vm6, 1, %v2622_v0  ;;  %v468_v17 = vsel %vm436_vm7, 1, %v2622_v0  ;;  %v469_v18 = vsel %vm437_vm8, 1, %v2622_v0  ;;  %vm439_vm9 = vcmp.gt.f32.partialorder %v407_v19, 0.5  ;;  %v408_v25 = vld [vmem:[%s2734_s25 + $0x30] sm:$0xff]  ;;  %v425_v27 = vld [vmem:[%s2734_s25 + $0xb8] sm:$0xff] }
  0x1f   : > { %vm455_vm10 = vcmp.gt.f32.partialorder %v423_v20, 0.5  ;;  %vm438_vm11 = vcmp.gt.f32.partialorder %v406_v21, 0.5  ;;  %v471_v22 = vsel %vm439_vm9, 1, %v2622_v0  ;;  %v424_v26 = vld [vmem:[%s2734_s25 + $0xb0] sm:$0xff]  ;;  %v414_v28 = vld [vmem:[%s2734_s25 + $0x60] sm:$0xff]  ;;  %vm440_vm12 = vcmp.gt.f32.partialorder %v408_v25, 0.5 }
  0x20   : > { %v487_v23 = vsel %vm455_vm10, 1, %v2622_v0  ;;  %v470_v24 = vsel %vm438_vm11, 1, %v2622_v0  ;;  %vm456_vm13 = vcmp.gt.f32.partialorder %v424_v26, 0.5  ;;  %vm446_vm14 = vcmp.gt.f32.partialorder %v414_v28, 0.5  ;;  %v430_v33 = vld [vmem:[%s2734_s25 + $0xe0] sm:$0xff]  ;;  %v431_v34 = vld [vmem:[%s2734_s25 + $0xe8] sm:$0xff] }
  0x21   : > { %vm457_vm15 = vcmp.gt.f32.partialorder %v425_v27, 0.5  ;;  %v2765_v29 = vsel %vm446_vm14, 1, %v2622_v0  ;;  %v472_v30 = vsel %vm440_vm12, 1, %v2622_v0  ;;  %v488_v31 = vsel %vm456_vm13, 1, %v2622_v0  ;;  %v427_v35 = vld [vmem:[%s2734_s25 + $0xc8] sm:$0xff]  ;;  %v409_v36 = vld [vmem:[%s2734_s25 + $0x38] sm:$0xff] }
  0x22   : > { %v489_v32 = vsel %vm457_vm15, 1, %v2622_v0  ;;  %vm462_vm0 = vcmp.gt.f32.partialorder %v430_v33, 0.5  ;;  %vm463_vm1 = vcmp.gt.f32.partialorder %v431_v34, 0.5  ;;  %v426_v37 = vld [vmem:[%s2734_s25 + $0xc0] sm:$0xff]  ;;  %v433_v40 = vld [vmem:[%s2734_s25 + $0xf8] sm:$0xff]  ;;  %vm459_vm2 = vcmp.gt.f32.partialorder %v427_v35, 0.5 }
  0x23   : > { %v494_v38 = vsel %vm462_vm0, 1, %v2622_v0  ;;  %v495_v39 = vsel %vm463_vm1, 1, %v2622_v0  ;;  %vm441_vm3 = vcmp.gt.f32.partialorder %v409_v36, 0.5  ;;  %vm465_vm4 = vcmp.gt.f32.partialorder %v433_v40, 0.5  ;;  %v415_v45 = vld [vmem:[%s2734_s25 + $0x68] sm:$0xff]  ;;  %v432_v46 = vld [vmem:[%s2734_s25 + $0xf0] sm:$0xff] }
  0x24   : > { %556 = vperm.xlu2 %2485, %v485_v10   ;;  %550 = vperm.xlu0 %2483, %v483_v11   ;;  %vm458_vm5 = vcmp.gt.f32.partialorder %v426_v37, 0.5  ;;  %v497_v41 = vsel %vm465_vm4, 1, %v2622_v0  ;;  %v491_v42 = vsel %vm459_vm2, 1, %v2622_v0  ;;  %v473_v43 = vsel %vm441_vm3, 1, %v2622_v0  ;;  %v428_v47 = vld [vmem:[%s2734_s25 + $0xd0] sm:$0xff]  ;;  %v410_v48 = vld [vmem:[%s2734_s25 + $0x40] sm:$0xff] }
  0x25   : > { %502 = vperm.xlu1 %2484, %v467_v12   ;;  %v490_v44 = vsel %vm458_vm5, 1, %v2622_v0  ;;  %vm447_vm6 = vcmp.gt.f32.partialorder %v415_v45, 0.5  ;;  %vm464_vm7 = vcmp.gt.f32.partialorder %v432_v46, 0.5  ;;  %v411_v49 = vld [vmem:[%s2734_s25 + $0x48] sm:$0xff]  ;;  %v416_v52 = vld [vmem:[%s2734_s25 + $0x70] sm:$0xff]  ;;  %vm460_vm8 = vcmp.gt.f32.partialorder %v428_v47, 0.5 }
  0x26   : > { %v479_v50 = vsel %vm447_vm6, 1, %v2622_v0  ;;  %v496_v51 = vsel %vm464_vm7, 1, %v2622_v0  ;;  %vm442_vm9 = vcmp.gt.f32.partialorder %v410_v48, 0.5  ;;  %vm448_vm10 = vcmp.gt.f32.partialorder %v416_v52, 0.5  ;;  %v417_v57 = vld [vmem:[%s2734_s25 + $0x78] sm:$0xff]  ;;  %v412_v60 = vld [vmem:[%s2734_s25 + $0x50] sm:$0xff] }
  0x27   : > { %vm443_vm11 = vcmp.gt.f32.partialorder %v411_v49, 0.5  ;;  %v480_v53 = vsel %vm448_vm10, 1, %v2622_v0  ;;  %v492_v54 = vsel %vm460_vm8, 1, %v2622_v0  ;;  %v474_v55 = vsel %vm442_vm9, 1, %v2622_v0  ;;  %v413_v58 = vld [vmem:[%s2734_s25 + $0x58] sm:$0xff]  ;;  %v2286_v3 = vld [vmem:[%s4232_s2 + $0x30] sm:$0xff] }
  0x28   : > { %v475_v56 = vsel %vm443_vm11, 1, %v2622_v0  ;;  %v429_v59 = vld [vmem:[%s2734_s25 + $0xd8] sm:$0xff]  ;;  %vm449_vm12 = vcmp.gt.f32.partialorder %v417_v57, 0.5  ;;  %vm445_vm13 = vcmp.gt.f32.partialorder %v413_v58, 0.5  ;;  %vm444_vm15 = vcmp.gt.f32.partialorder %v412_v60, 0.5  ;;  %v2284_v4 = vld [vmem:[%s4232_s2 + $0x20] sm:$0xff] }
  0x29   : > { %v481_v61 = vsel %vm449_vm12, 1, %v2622_v0  ;;  %vm461_vm14 = vcmp.gt.f32.partialorder %v429_v59, 0.5  ;;  %v477_v62 = vsel %vm445_vm13, 1, %v2622_v0  ;;  %v476_v1 = vsel %vm444_vm15, 1, %v2622_v0  ;;  %v2287_v2 = vld [vmem:[%s4232_s2 + $0x38] sm:$0xff]  ;;  %v2282_v6 = vld [vmem:[%s4232_s2 + $0x10] sm:$0xff] }
  0x2a   : > { %v493_v63 = vsel %vm461_vm14, 1, %v2622_v0  ;;  %742 = vmatpush.bf16.msra.mxu0 %v2287_v2  ;;  %2424 = vmatpush.bf16.msra.mxu2 %v2287_v2  ;;  %v2285_v0 = vld [vmem:[%s4232_s2 + $0x28] sm:$0xff]  ;;  %v2283_v5 = vld [vmem:[%s4232_s2 + $0x18] sm:$0xff]  ;;  %v2280_v8 = vld [vmem:[%s4232_s2] sm:$0xff]  ;;  %s3294_s25 = scalar_lea.vmem [#allocation2], %s2124_s24  ;;  %s4048_s24 = scalar_lea.vmem %s4239_s9, %s2728_s22 }
  0x2b   : > { %v2281_v7 = vld [vmem:[%s4232_s2 + $0x8] sm:$0xff]  ;;  %v386_v11 = vld [vmem:[%s2831_s21 + $0x80] sm:$0xff]  ;;  %v388_v21 = vld [vmem:[%s2831_s21 + $0x90] sm:$0xff]  ;;  %s2296_s22 = sshll.u32 %s2697_s13, 7  ;;  %s2014_s26 = sshll.u32 %s3294_s25, 4  ;;  %s2015_s26 = int_to_ptr.vmem [resolvable:$true] %s2014_s26 }
  0x2c   : > { %559 = vperm.xlu2 %2485, %v486_v16   ;;  %505 = vperm.xlu0 %2483, %v468_v17   ;;  %v387_v12 = vld [vmem:[%s2831_s21 + $0x88] sm:$0xff]  ;;  %v370_v13 = vld [vmem:[%s2831_s21] sm:$0xff]  ;;  %v372_v25 = vld [vmem:[%s2831_s21 + $0x10] sm:$0xff]  ;;  %s2013_s29 = scalar_lea.hbm %s4238_s8, %s2296_s22  ;;  %s2578_s22 = scalar_lea.hbm %s4238_s8, 256 }
  0x2d   : > { %508 = vperm.xlu1 %2484, %v469_v18   ;;  %v371_v14 = vld [vmem:[%s2831_s21 + $0x8] sm:$0xff]  ;;  %v2206_v15 = vpack.c.bf16 %v387_v12, %v386_v11  ;;  %v373_v26 = vld [vmem:[%s2831_s21 + $0x18] sm:$0xff]  ;;  %v374_v34 = vld [vmem:[%s2831_s21 + $0x20] sm:$0xff]  ;;  %s2016_s14 = sshll.u32 %s2013_s29, 4  ;;  %s2017_s14 = int_to_ptr.hbm [resolvable:$true] %s2016_s14 }
  0x2e   : > { %743 = vmatpush.bf16.msra.mxu0 %v2286_v3  ;;  %2425 = vmatpush.bf16.msra.mxu2 %v2286_v3  ;;  %v2166_v17 = vpack.c.bf16 %v371_v14, %v370_v13  ;;  %v2171_v28 = vpack.c.bf16 %v373_v26, %v372_v25  ;;  %v375_v35 = vld [vmem:[%s2831_s21 + $0x28] sm:$0xff]  ;;  %v377_v45 = vld [vmem:[%s2831_s21 + $0x38] sm:$0xff]  ;;  %v2868_v25 = vld [vmem:[%s4233_s3] ss:$0 sm:$0xff]  ;;  %s2572_s17 = sshra.s32 %s2017_s14, 4  ;;  %s2573_s17 = int_to_ptr.hbm [resolvable:$true] %s2572_s17 }
  0x2f   : > { %v395_v52 = vld [vmem:[%s2831_s21 + $0xc8] sm:$0xff]  ;;  %v381_v2 = vld [vmem:[%s2831_s21 + $0x58] sm:$0xff]  ;;  %p2579_p0 = scmp.lt.s32.totalorder %s2573_s17, %s4238_s8 }
  0x30   : > { %v383_v11 = vld [vmem:[%s2831_s21 + $0x68] sm:$0xff] }
  0x32   : > { %744 = vmatpush.bf16.msra.mxu0 %v2285_v0  ;;  %2426 = vmatpush.bf16.msra.mxu2 %v2285_v0 }
  0x34   : > { %514 = vperm.xlu2 %2485, %v471_v22   ;;  %562 = vperm.xlu0 %2483, %v487_v23   ;;  %v389_v22 = vld [vmem:[%s2831_s21 + $0x98] sm:$0xff] }
  0x35   : > { %511 = vperm.xlu1 %2484, %v470_v24   ;;  %v2211_v27 = vpack.c.bf16 %v389_v22, %v388_v21  ;;  %v385_v21 = vld [vmem:[%s2831_s21 + $0x78] sm:$0xff] }
  0x36   : > { %745 = vmatpush.bf16.msra.mxu0 %v2284_v4  ;;  %2427 = vmatpush.bf16.msra.mxu2 %v2284_v4 }
  0x3a   : > { %746 = vmatpush.bf16.msra.mxu0 %v2283_v5  ;;  %2428 = vmatpush.bf16.msra.mxu2 %v2283_v5 }
  0x3c   : > { %517 = vperm.xlu2 %2485, %v472_v30   ;;  %565 = vperm.xlu0 %2483, %v488_v31   ;;  %v390_v31 = vld [vmem:[%s2831_s21 + $0xa0] sm:$0xff] }
  0x3d   : > { %568 = vperm.xlu1 %2484, %v489_v32   ;;  %v391_v32 = vld [vmem:[%s2831_s21 + $0xa8] sm:$0xff] }
  0x3e   : > { %747 = vmatpush.bf16.msra.mxu0 %v2282_v6  ;;  %2429 = vmatpush.bf16.msra.mxu2 %v2282_v6  ;;  %v2216_v37 = vpack.c.bf16 %v391_v32, %v390_v31 }
  0x42   : > { %748 = vmatpush.bf16.msra.mxu0 %v2281_v7  ;;  %2430 = vmatpush.bf16.msra.mxu2 %v2281_v7  ;;  %v398_v7 = vld [vmem:[%s2831_s21 + $0xe0] sm:$0xff] }
  0x44   : > { %574 = vperm.xlu2 %2485, %v491_v42   ;;  %520 = vperm.xlu0 %2483, %v473_v43   ;;  %v393_v42 = vld [vmem:[%s2831_s21 + $0xb8] sm:$0xff] }
  0x45   : > { %571 = vperm.xlu1 %2484, %v490_v44   ;;  %v376_v44 = vld [vmem:[%s2831_s21 + $0x30] sm:$0xff] }
  0x46   : > { %749 = vmatpush.bf16.msra.mxu0 %v2280_v8  ;;  %2431 = vmatpush.bf16.msra.mxu2 %v2280_v8  ;;  %v2181_v47 = vpack.c.bf16 %v377_v45, %v376_v44  ;;  %v399_v8 = vld [vmem:[%s2831_s21 + $0xe8] sm:$0xff] }
  0x47   : > { %v2236_v13 = vpack.c.bf16 %v399_v8, %v398_v7 }
  0x4c   : > { %577 = vperm.xlu2 %2485, %v492_v54   ;;  %523 = vperm.xlu0 %2483, %v474_v55   ;;  %v378_v55 = vld [vmem:[%s2831_s21 + $0x40] sm:$0xff] }
  0x4d   : > { %526 = vperm.xlu1 %2484, %v475_v56   ;;  %v379_v56 = vld [vmem:[%s2831_s21 + $0x48] sm:$0xff] }
  0x4e   : > { %v2186_v58 = vpack.c.bf16 %v379_v56, %v378_v55 }
  0x54   : > { %532 = vperm.xlu2 %2485, %v477_v62   ;;  %580 = vperm.xlu0 %2483, %v493_v63   ;;  %v397_v62 = vld [vmem:[%s2831_s21 + $0xd8] sm:$0xff] }
  0x55   : > { %529 = vperm.xlu1 %2484, %v476_v1   ;;  %v380_v1 = vld [vmem:[%s2831_s21 + $0x50] sm:$0xff] }
  0x56   : > { %v2191_v4 = vpack.c.bf16 %v381_v2, %v380_v1 }
  0x5c   : > { %535 = vperm.xlu2 %2485, %v2765_v29   ;;  %583 = vperm.xlu0 %2483, %v494_v38   ;;  %v2176_v38 = vpack.c.bf16 %v375_v35, %v374_v34 }
  0x5d   : > { %586 = vperm.xlu1 %2484, %v495_v39  }
  0x64   : > { %592 = vperm.xlu2 %2485, %v497_v41   ;;  %538 = vperm.xlu0 %2483, %v479_v50   ;;  %v392_v41 = vld [vmem:[%s2831_s21 + $0xb0] sm:$0xff] }
  0x65   : > { %589 = vperm.xlu1 %2484, %v496_v51   ;;  %v2221_v46 = vpack.c.bf16 %v393_v42, %v392_v41  ;;  %v394_v51 = vld [vmem:[%s2831_s21 + $0xc0] sm:$0xff] }
  0x66   : > { %v2226_v57 = vpack.c.bf16 %v395_v52, %v394_v51 }
  0x6c   : > { %541 = vperm.xlu0 %2483, %v480_v53  }
  0x6d   : > { %544 = vperm.xlu1 %2484, %v481_v61   ;;  %v396_v61 = vld [vmem:[%s2831_s21 + $0xd0] sm:$0xff] }
  0x6e   : > { %v2231_v0 = vpack.c.bf16 %v397_v62, %v396_v61 }
  0x76   : > { %v554_v18 = vpop.permute.xlu2 %553 }
  0x77   : > { %vm2396_vm6 = vcmp.ne.s32.totalorder %v554_v18, 1 }
  0x7e   : > { %v557_v20 = vpop.permute.xlu2 %556 }
  0x7f   : > { %vm2395_vm7 = vcmp.ne.s32.totalorder %v557_v20, 1  ;;  %v384_v20 = vld [vmem:[%s2831_s21 + $0x70] sm:$0xff] }
  0x80   : > { %vm2210_vm8 = vmpackc.low %vm2395_vm7, %vm2396_vm6 }
  0x86   : > { %v560_v29 = vpop.permute.xlu2 %559 }
  0x87   : > { %vm2398_vm12 = vcmp.ne.s32.totalorder %v560_v29, 1 }
  0x8e   : > { %v548_v9 = vpop.permute.xlu0 %547  ;;  %v515_v36 = vpop.permute.xlu2 %514 }
  0x8f   : > { %v500_v10 = vpop.permute.xlu1 %499  ;;  %vm2394_vm0 = vcmp.ne.s32.totalorder %v548_v9, 1  ;;  %vm2381_vm14 = vcmp.ne.s32.totalorder %v515_v36, 1 }
  0x90   : > { %vm2378_vm2 = vcmp.ne.s32.totalorder %v500_v10, 1  ;;  %v382_v10 = vld [vmem:[%s2831_s21 + $0x60] sm:$0xff] }
  0x91   : > { %v2196_v14 = vpack.c.bf16 %v383_v11, %v382_v10 }
  0x96   : > { %v551_v16 = vpop.permute.xlu0 %550  ;;  %v518_v48 = vpop.permute.xlu2 %517 }
  0x97   : > { %vm2393_vm1 = vcmp.ne.s32.totalorder %v551_v16, 1  ;;  %v503_v19 = vpop.permute.xlu1 %502  ;;  %v400_v16 = vld [vmem:[%s2831_s21 + $0xf0] sm:$0xff] }
  0x98   : > { %vm2205_vm3 = vmpackc.low %vm2393_vm1, %vm2394_vm0  ;;  %vm2377_vm4 = vcmp.ne.s32.totalorder %v503_v19, 1 }
  0x99   : > { %vm2165_vm5 = vmpackc.low %vm2377_vm4, %vm2378_vm2  ;;  %2207 = vmatmul.msk.bf16.vlgmr.msra.gmra.mxu2 %vm2205_vm3, %v2206_v15 }
  0x9a   : > { %2167 = vmatmul.msk.bf16.vlgmr.msra.gmra.mxu0 %vm2165_vm5, %v2166_v17  ;;  %vm2384_vm5 = vcmp.ne.s32.totalorder %v518_v48, 1  ;;  %v401_v17 = vld [vmem:[%s2831_s21 + $0xf8] sm:$0xff]  ;;  %s2574_s21 = scalar_lea.hbm %s2573_s17, 128 }
  0x9b   : > { %p2575_p11 = scmp.ne.s32.totalorder %s2573_s17, %s2574_s21  ;;  %p2580_p1 = scmp.lt.s32.totalorder %s2578_s22, %s2574_s21 }
  0x9d   : > { %p2576_p12 = pnand %p2575_p11, %p2714_p5  ;;  %p2581_p2 = por %p2580_p1, %p2579_p0 }
  0x9e   : > { %v506_v23 = vpop.permute.xlu0 %505  ;;  %v575_v50 = vpop.permute.xlu2 %574 }
  0x9f   : > { %v509_v24 = vpop.permute.xlu1 %508  ;;  %vm2380_vm9 = vcmp.ne.s32.totalorder %v506_v23, 1  ;;  %v2241_v23 = vpack.c.bf16 %v401_v17, %v400_v16  ;;  %p2577_p13 = pneg %p2576_p12 }
  0xa0   : > { %vm2379_vm10 = vcmp.ne.s32.totalorder %v509_v24, 1  ;;  %v2201_v24 = vpack.c.bf16 %v385_v21, %v384_v20 }
  0xa1   : > { %vm2170_vm11 = vmpackc.low %vm2379_vm10, %vm2380_vm9  ;;  %p2582_p3 = pnand %p2581_p2, %p2577_p13 }
  0xa6   : > { %v563_v30 = vpop.permute.xlu0 %562  ;;  %v578_v59 = vpop.permute.xlu2 %577 }
  0xa7   : > { %v512_v33 = vpop.permute.xlu1 %511  ;;  %vm2397_vm13 = vcmp.ne.s32.totalorder %v563_v30, 1 }
  0xa8   : > { %vm2382_vm15 = vcmp.ne.s32.totalorder %v512_v33, 1  ;;  %vm2215_vm0 = vmpackc.low %vm2397_vm13, %vm2398_vm12 }
  0xa9   : > { %2212 = vmatmul.msk.bf16.gmra.mxu2 %vm2210_vm8, %v2211_v27  ;;  %vm2175_vm1 = vmpackc.low %vm2381_vm14, %vm2382_vm15 }
  0xaa   : > { %2172 = vmatmul.msk.bf16.gmra.mxu0 %vm2170_vm11, %v2171_v28  ;;  %vm2401_vm11 = vcmp.ne.s32.totalorder %v575_v50, 1 }
  0xae   : > { %v566_v39 = vpop.permute.xlu0 %565  ;;  %v533_v3 = vpop.permute.xlu2 %532 }
  0xaf   : > { %v569_v40 = vpop.permute.xlu1 %568  ;;  %vm2400_vm2 = vcmp.ne.s32.totalorder %v566_v39, 1 }
  0xb0   : > { %vm2399_vm3 = vcmp.ne.s32.totalorder %v569_v40, 1 }
  0xb1   : > { %vm2220_vm6 = vmpackc.low %vm2399_vm3, %vm2400_vm2 }
  0xb6   : > { %v521_v43 = vpop.permute.xlu0 %520  ;;  %v536_v12 = vpop.permute.xlu2 %535 }
  0xb7   : > { %vm2383_vm4 = vcmp.ne.s32.totalorder %v521_v43, 1  ;;  %v572_v49 = vpop.permute.xlu1 %571 }
  0xb8   : > { %vm2180_vm7 = vmpackc.low %vm2383_vm4, %vm2384_vm5  ;;  %vm2402_vm8 = vcmp.ne.s32.totalorder %v572_v49, 1 }
  0xb9   : > { %2217 = vmatmul.msk.bf16.gmra.mxu2 %vm2215_vm0, %v2216_v37  ;;  %vm2225_vm12 = vmpackc.low %vm2401_vm11, %vm2402_vm8  ;;  %vm2404_vm0 = vcmp.ne.s32.totalorder %v578_v59, 1 }
  0xba   : > { %2177 = vmatmul.msk.bf16.gmra.mxu0 %vm2175_vm1, %v2176_v38  ;;  %vm2387_vm1 = vcmp.ne.s32.totalorder %v533_v3, 1 }
  0xbe   : > { %v524_v53 = vpop.permute.xlu0 %523  ;;  %v593_v22 = vpop.permute.xlu2 %592 }
  0xbf   : > { %v527_v54 = vpop.permute.xlu1 %526  ;;  %vm2386_vm9 = vcmp.ne.s32.totalorder %v524_v53, 1 }
  0xc0   : > { %vm2385_vm10 = vcmp.ne.s32.totalorder %v527_v54, 1 }
  0xc1   : > { %vm2185_vm13 = vmpackc.low %vm2385_vm10, %vm2386_vm9 }
  0xc6   : > { %v581_v60 = vpop.permute.xlu0 %580 }
  0xc7   : > { %v530_v63 = vpop.permute.xlu1 %529  ;;  %vm2403_vm14 = vcmp.ne.s32.totalorder %v581_v60, 1 }
  0xc8   : > { %vm2388_vm15 = vcmp.ne.s32.totalorder %v530_v63, 1  ;;  %vm2230_vm2 = vmpackc.low %vm2403_vm14, %vm2404_vm0 }
  0xc9   : > { %2222 = vmatmul.msk.bf16.gmra.mxu2 %vm2220_vm6, %v2221_v46  ;;  %vm2190_vm3 = vmpackc.low %vm2387_vm1, %vm2388_vm15 }
  0xca   : > { %2182 = vmatmul.msk.bf16.gmra.mxu0 %vm2180_vm7, %v2181_v47  ;;  %vm2390_vm7 = vcmp.ne.s32.totalorder %v536_v12, 1 }
  0xce   : > { %v584_v5 = vpop.permute.xlu0 %583 }
  0xcf   : > { %v587_v6 = vpop.permute.xlu1 %586  ;;  %vm2406_vm4 = vcmp.ne.s32.totalorder %v584_v5, 1 }
  0xd0   : > { %vm2405_vm5 = vcmp.ne.s32.totalorder %v587_v6, 1 }
  0xd1   : > { %vm2235_vm8 = vmpackc.low %vm2405_vm5, %vm2406_vm4 }
  0xd6   : > { %v539_v9 = vpop.permute.xlu0 %538 }
  0xd7   : > { %vm2389_vm6 = vcmp.ne.s32.totalorder %v539_v9, 1  ;;  %v590_v15 = vpop.permute.xlu1 %589 }
  0xd8   : > { %vm2195_vm9 = vmpackc.low %vm2389_vm6, %vm2390_vm7  ;;  %vm2408_vm10 = vcmp.ne.s32.totalorder %v590_v15, 1 }
  0xd9   : > { %2227 = vmatmul.msk.bf16.gmra.mxu2 %vm2225_vm12, %v2226_v57 }
  0xda   : > { %2187 = vmatmul.msk.bf16.gmra.mxu0 %vm2185_vm13, %v2186_v58  ;;  %vm2407_vm13 = vcmp.ne.s32.totalorder %v593_v22, 1 }
  0xdb   : > { %vm2240_vm14 = vmpackc.low %vm2407_vm13, %vm2408_vm10 }
  0xde   : > { %v542_v18 = vpop.permute.xlu0 %541 }
  0xdf   : > { %v545_v19 = vpop.permute.xlu1 %544  ;;  %vm2392_vm11 = vcmp.ne.s32.totalorder %v542_v18, 1  ;;  %v2623_v18 = vmov 128.0  }
  0xe0   : > { %vm2391_vm12 = vcmp.ne.s32.totalorder %v545_v19, 1  ;;  %2490 = vrcp.f32 %v2623_v18  ;;  %v2290_v18 = vld [vmem:[%s4236_s6 + $0x10] sm:$0xff] }
  0xe1   : > { %vm2200_vm15 = vmpackc.low %vm2391_vm12, %vm2392_vm11 }
  0xe6   : > { %v2491_v21 = vpop.eup %2490 }
  0xe7   : > { %vm900_vm0 = vweird.f32 %v2491_v21 }
  0xe9   : > { %2232 = vmatmul.msk.bf16.gmra.mxu2 %vm2230_vm2, %v2231_v0 }
  0xea   : > { %2192 = vmatmul.msk.bf16.gmra.mxu0 %vm2190_vm3, %v2191_v4 }
  0xf9   : > { %2237 = vmatmul.msk.bf16.gmra.mxu2 %vm2235_vm8, %v2236_v13 }
  0xfa   : > { %2197 = vmatmul.msk.bf16.gmra.mxu0 %vm2195_vm9, %v2196_v14 }
 0x109   : > { %2242 = vmatmul.msk.bf16.gmra.mxu2 %vm2240_vm14, %v2241_v23 }
 0x10a   : > { %2202 = vmatmul.msk.bf16.gmra.mxu0 %vm2200_vm15, %v2201_v24 }
 0x117   : > { %v751_v26 = vpop.f32.mrf.mxu0 }
 0x118   : > { %v2871_v27 = vadd.f32 %v2868_v25, %v751_v26  ;;  %v896_v26 = vmul.f32 128.0, %v2491_v21 }
 0x11a   : > { %831 = vadd.xlane.f32.xlu2 %v2871_v27  ;;  %v934_v28 = vmul.f32 %v2871_v27, %v2871_v27 }
 0x11c   : > { %966 = vadd.xlane.f32.xlu1 %v934_v28  ;;  %v791_v29 = vpop.f32.mrf.mxu2 }
 0x11d   : > { %v2877_v30 = vadd.f32 %v2868_v25, %v791_v29  ;;  %v897_v29 = vsub.f32 1.0, %v896_v26 }
 0x11f   : > { %v753_v31 = vpop.f32.mrf.mxu0  ;;  %v950_v33 = vmul.f32 %v2877_v30, %v2877_v30 }
 0x120   : > { %v2880_v32 = vadd.f32 %v2868_v25, %v753_v31 }
 0x122   : > { %833 = vadd.xlane.f32.xlu0 %v2880_v32  ;;  %863 = vadd.xlane.f32.xlu2 %v2877_v30  ;;  %v935_v37 = vmul.f32 %v2880_v32, %v2880_v32 }
 0x124   : > { %998 = vadd.xlane.f32.xlu1 %v950_v33  ;;  %v793_v34 = vpop.f32.mrf.mxu2 }
 0x125   : > { %v2887_v36 = vadd.f32 %v2868_v25, %v793_v34 }
 0x127   : > { %v756_v35 = vpop.f32.mrf.mxu0  ;;  %v951_v43 = vmul.f32 %v2887_v36, %v2887_v36 }
 0x128   : > { %v2892_v38 = vadd.f32 %v2868_v25, %v756_v35  ;;  %v898_v35 = vmul.f32 %v2491_v21, %v897_v29 }
 0x12a   : > { %865 = vadd.xlane.f32.xlu0 %v2887_v36  ;;  %968 = vadd.xlane.f32.xlu2 %v935_v37  ;;  %v936_v42 = vmul.f32 %v2892_v38, %v2892_v38 }
 0x12c   : > { %835 = vadd.xlane.f32.xlu1 %v2892_v38  ;;  %v796_v39 = vpop.f32.mrf.mxu2 }
 0x12d   : > { %v2906_v45 = vadd.f32 %v2868_v25, %v796_v39 }
 0x12f   : > { %v758_v40 = vpop.f32.mrf.mxu0  ;;  %v952_v48 = vmul.f32 %v2906_v45, %v2906_v45 }
 0x130   : > { %v2897_v41 = vadd.f32 %v2868_v25, %v758_v40  ;;  %v2295_v40 = vld [vmem:[%s4236_s6 + $0x38] sm:$0xff] }
 0x131   : > { %1874 = vmatpush.bf16.msra.mxu1 %v2295_v40  ;;  %2432 = vmatpush.bf16.msra.mxu3 %v2295_v40 }
 0x132   : > { %970 = vadd.xlane.f32.xlu0 %v936_v42  ;;  %1000 = vadd.xlane.f32.xlu2 %v951_v43  ;;  %v937_v44 = vmul.f32 %v2897_v41, %v2897_v41  ;;  %v899_v42 = vadd.f32 %v2491_v21, %v898_v35 }
 0x134   : > { %972 = vadd.xlane.f32.xlu1 %v937_v44  ;;  %v798_v46 = vpop.f32.mrf.mxu2  ;;  %v2294_v44 = vld [vmem:[%s4236_s6 + $0x30] sm:$0xff] }
 0x135   : > { %v2911_v49 = vadd.f32 %v2868_v25, %v798_v46  ;;  %1875 = vmatpush.bf16.msra.mxu1 %v2294_v44  ;;  %2433 = vmatpush.bf16.msra.mxu3 %v2294_v44 }
 0x137   : > { %v761_v47 = vpop.f32.mrf.mxu0  ;;  %v953_v52 = vmul.f32 %v2911_v49, %v2911_v49 }
 0x138   : > { %v2924_v55 = vadd.f32 %v2868_v25, %v761_v47 }
 0x13a   : > { %867 = vadd.xlane.f32.xlu0 %v2906_v45  ;;  %1002 = vadd.xlane.f32.xlu2 %v952_v48  ;;  %v938_v57 = vmul.f32 %v2924_v55, %v2924_v55  ;;  %v3010_v48 = vsel %vm900_vm0, %v2491_v21, %v899_v42 }
 0x13c   : > { %869 = vadd.xlane.f32.xlu1 %v2911_v49  ;;  %v801_v50 = vpop.f32.mrf.mxu2 }
 0x13d   : > { %v2916_v51 = vadd.f32 %v2868_v25, %v801_v50  ;;  %v2293_v50 = vld [vmem:[%s4236_s6 + $0x28] sm:$0xff] }
 0x13e   : > { %1876 = vmatpush.bf16.msra.mxu1 %v2293_v50  ;;  %2434 = vmatpush.bf16.msra.mxu3 %v2293_v50 }
 0x13f   : > { %v763_v53 = vpop.f32.mrf.mxu0  ;;  %v954_v54 = vmul.f32 %v2916_v51, %v2916_v51 }
 0x140   : > { %v2929_v58 = vadd.f32 %v2868_v25, %v763_v53 }
 0x142   : > { %1004 = vadd.xlane.f32.xlu0 %v953_v52  ;;  %837 = vadd.xlane.f32.xlu2 %v2897_v41  ;;  %v939_v61 = vmul.f32 %v2929_v58, %v2929_v58 }
 0x144   : > { %1006 = vadd.xlane.f32.xlu1 %v954_v54  ;;  %v803_v56 = vpop.f32.mrf.mxu2 }
 0x145   : > { %v2942_v1 = vadd.f32 %v2868_v25, %v803_v56 }
 0x147   : > { %v766_v59 = vpop.f32.mrf.mxu0  ;;  %v955_v3 = vmul.f32 %v2942_v1, %v2942_v1 }
 0x148   : > { %v2934_v60 = vadd.f32 %v2868_v25, %v766_v59 }
 0x14a   : > { %839 = vadd.xlane.f32.xlu0 %v2924_v55  ;;  %974 = vadd.xlane.f32.xlu2 %v938_v57  ;;  %v940_v63 = vmul.f32 %v2934_v60, %v2934_v60 }
 0x14c   : > { %841 = vadd.xlane.f32.xlu1 %v2929_v58  ;;  %v806_v62 = vpop.f32.mrf.mxu2 }
 0x14d   : > { %v2947_v0 = vadd.f32 %v2868_v25, %v806_v62 }
 0x14f   : > { %v768_v2 = vpop.f32.mrf.mxu0  ;;  %v956_v6 = vmul.f32 %v2947_v0, %v2947_v0 }
 0x150   : > { %v2960_v9 = vadd.f32 %v2868_v25, %v768_v2 }
 0x152   : > { %976 = vadd.xlane.f32.xlu0 %v939_v61  ;;  %871 = vadd.xlane.f32.xlu2 %v2916_v51  ;;  %v941_v11 = vmul.f32 %v2960_v9, %v2960_v9 }
 0x154   : > { %978 = vadd.xlane.f32.xlu1 %v940_v63  ;;  %v808_v4 = vpop.f32.mrf.mxu2  ;;  %v2292_v63 = vld [vmem:[%s4236_s6 + $0x20] sm:$0xff] }
 0x155   : > { %v2952_v5 = vadd.f32 %v2868_v25, %v808_v4  ;;  %1877 = vmatpush.bf16.msra.mxu1 %v2292_v63  ;;  %2435 = vmatpush.bf16.msra.mxu3 %v2292_v63 }
 0x157   : > { %v771_v7 = vpop.f32.mrf.mxu0  ;;  %v957_v8 = vmul.f32 %v2952_v5, %v2952_v5 }
 0x158   : > { %v2965_v12 = vadd.f32 %v2868_v25, %v771_v7  ;;  %v2291_v7 = vld [vmem:[%s4236_s6 + $0x18] sm:$0xff] }
 0x159   : > { %1878 = vmatpush.bf16.msra.mxu1 %v2291_v7  ;;  %2436 = vmatpush.bf16.msra.mxu3 %v2291_v7 }
 0x15a   : > { %873 = vadd.xlane.f32.xlu0 %v2942_v1  ;;  %1008 = vadd.xlane.f32.xlu2 %v955_v3  ;;  %v942_v16 = vmul.f32 %v2965_v12, %v2965_v12 }
 0x15c   : > { %875 = vadd.xlane.f32.xlu1 %v2947_v0  ;;  %v811_v10 = vpop.f32.mrf.mxu2 }
 0x15d   : > { %v2978_v19 = vadd.f32 %v2868_v25, %v811_v10  ;;  %1879 = vmatpush.bf16.msra.mxu1 %v2290_v18  ;;  %2437 = vmatpush.bf16.msra.mxu3 %v2290_v18 }
 0x15f   : > { %v773_v13 = vpop.f32.mrf.mxu0  ;;  %v958_v22 = vmul.f32 %v2978_v19, %v2978_v19 }
 0x160   : > { %v2970_v14 = vadd.f32 %v2868_v25, %v773_v13 }
 0x162   : > { %1010 = vadd.xlane.f32.xlu0 %v956_v6  ;;  %843 = vadd.xlane.f32.xlu2 %v2934_v60  ;;  %v943_v17 = vmul.f32 %v2970_v14, %v2970_v14 }
 0x164   : > { %1012 = vadd.xlane.f32.xlu1 %v957_v8  ;;  %v813_v15 = vpop.f32.mrf.mxu2 }
 0x165   : > { %v2983_v23 = vadd.f32 %v2868_v25, %v813_v15 }
 0x167   : > { %v776_v20 = vpop.f32.mrf.mxu0  ;;  %v959_v31 = vmul.f32 %v2983_v23, %v2983_v23 }
 0x168   : > { %v2996_v37 = vadd.f32 %v2868_v25, %v776_v20 }
 0x16a   : > { %845 = vadd.xlane.f32.xlu0 %v2960_v9  ;;  %980 = vadd.xlane.f32.xlu2 %v941_v11  ;;  %v944_v43 = vmul.f32 %v2996_v37, %v2996_v37 }
 0x16c   : > { %847 = vadd.xlane.f32.xlu1 %v2965_v12  ;;  %v816_v24 = vpop.f32.mrf.mxu2 }
 0x16d   : > { %v2988_v28 = vadd.f32 %v2868_v25, %v816_v24 }
 0x16f   : > { %v778_v33 = vpop.f32.mrf.mxu0  ;;  %v960_v34 = vmul.f32 %v2988_v28, %v2988_v28 }
 0x170   : > { %v3007_v46 = vadd.f32 %v2868_v25, %v778_v33 }
 0x172   : > { %982 = vadd.xlane.f32.xlu0 %v942_v16  ;;  %877 = vadd.xlane.f32.xlu2 %v2952_v5  ;;  %v945_v62 = vmul.f32 %v3007_v46, %v3007_v46 }
 0x174   : > { %984 = vadd.xlane.f32.xlu1 %v943_v17  ;;  %v818_v39 = vpop.f32.mrf.mxu2 }
 0x175   : > { %v3034_v4 = vadd.f32 %v2868_v25, %v818_v39 }
 0x177   : > { %v781_v47 = vpop.f32.mrf.mxu0  ;;  %v961_v17 = vmul.f32 %v3034_v4, %v3034_v4 }
 0x178   : > { %v3017_v53 = vadd.f32 %v2868_v25, %v781_v47 }
 0x17a   : > { %879 = vadd.xlane.f32.xlu0 %v2978_v19  ;;  %1014 = vadd.xlane.f32.xlu2 %v958_v22  ;;  %v946_v3 = vmul.f32 %v3017_v53, %v3017_v53 }
 0x17c   : > { %881 = vadd.xlane.f32.xlu1 %v2983_v23  ;;  %v821_v54 = vpop.f32.mrf.mxu2 }
 0x17d   : > { %v3054_v22 = vadd.f32 %v2868_v25, %v821_v54 }
 0x17f   : > { %v783_v29 = vpop.f32.mrf.mxu0  ;;  %v962_v54 = vmul.f32 %v3054_v22, %v3054_v22 }
 0x182   : > { %1016 = vadd.xlane.f32.xlu0 %v959_v31  ;;  %849 = vadd.xlane.f32.xlu2 %v2970_v14  ;;  %v2289_v31 = vld [vmem:[%s4236_s6 + $0x8] sm:$0xff] }
 0x183   : > { %1880 = vmatpush.bf16.msra.mxu1 %v2289_v31  ;;  %2438 = vmatpush.bf16.msra.mxu3 %v2289_v31  ;;  %v3105_v31 = vadd.f32 %v2868_v25, %v783_v29 }
 0x184   : > { %1018 = vadd.xlane.f32.xlu1 %v960_v34  ;;  %v823_v16 = vpop.f32.mrf.mxu2 }
 0x185   : > { %v3067_v40 = vadd.f32 %v2868_v25, %v823_v16 }
 0x18a   : > { %851 = vadd.xlane.f32.xlu0 %v2996_v37  ;;  %986 = vadd.xlane.f32.xlu2 %v944_v43 }
 0x18c   : > { %853 = vadd.xlane.f32.xlu1 %v3007_v46 }
 0x18d   : > { %v832_v52 = vpop.xlane.xlu2 %831 }
 0x18e   : > { %v3020_v56 = vmul.f32 %v3010_v48, %v832_v52 }
 0x18f   : > { %v967_v57 = vpop.xlane.xlu1 %966 }
 0x190   : > { %v1062_v59 = vmul.f32 %v3020_v56, %v3020_v56  ;;  %v1030_v61 = vmul.f32 %v967_v57, %v3010_v48  ;;  %v2288_v57 = vld [vmem:[%s4236_s6] sm:$0xff] }
 0x191   : > { %1881 = vmatpush.bf16.msra.mxu1 %v2288_v57  ;;  %2439 = vmatpush.bf16.msra.mxu3 %v2288_v57  ;;  %v1158_v57 = vsub.f32 %v2871_v27, %v3020_v56 }
 0x192   : > { %v1094_v2 = vsub.f32 %v1030_v61, %v1062_v59  ;;  %988 = vadd.xlane.f32.xlu0 %v945_v62  ;;  %883 = vadd.xlane.f32.xlu2 %v2988_v28  ;;  %v826_v62 = vpop.f32.mrf.mxu2 }
 0x193   : > { %v3145_v56 = vadd.f32 %v2868_v25, %v826_v62  ;;  %v947_v62 = vmul.f32 %v3105_v31, %v3105_v31 }
 0x194   : > { %v1126_v6 = vmax.f32 %v1094_v2, 0.0  ;;  %990 = vadd.xlane.f32.xlu1 %v946_v3  ;;  %v963_v3 = vmul.f32 %v3067_v40, %v3067_v40 }
 0x195   : > { %v834_v8 = vpop.xlane.xlu0 %833  ;;  %v864_v10 = vpop.xlane.xlu2 %863  ;;  %4247 = vst [vmem:[#allocation5_spill] sm:$0xff] %v3145_v56 }
 0x196   : > { %v3039_v11 = vadd.f32 1e-05, %v1126_v6  ;;  %v3042_v13 = vmul.f32 %v3010_v48, %v864_v10  ;;  %v3057_v24 = vmul.f32 %v3010_v48, %v834_v8 }
 0x197   : > { %v999_v15 = vpop.xlane.xlu1 %998 }
 0x198   : > { %2492 = vrsqrt.f32 %v3039_v11  ;;  %v1078_v20 = vmul.f32 %v3042_v13, %v3042_v13  ;;  %v1046_v21 = vmul.f32 %v999_v15, %v3010_v48  ;;  %v1063_v42 = vmul.f32 %v3057_v24, %v3057_v24 }
 0x199   : > { %vm1228_vm2 = vweird.f32 %v3039_v11 }
 0x19a   : > { %885 = vadd.xlane.f32.xlu0 %v3034_v4  ;;  %1020 = vadd.xlane.f32.xlu2 %v961_v17  ;;  %v1110_v26 = vsub.f32 %v1046_v21, %v1078_v20  ;;  %v786_v17 = vpop.f32.mrf.mxu0 }
 0x19c   : > { %887 = vadd.xlane.f32.xlu1 %v3054_v22  ;;  %v1142_v33 = vmax.f32 %v1110_v26, 0.0 }
 0x19d   : > { %v866_v34 = vpop.xlane.xlu0 %865  ;;  %v969_v35 = vpop.xlane.xlu2 %968 }
 0x19e   : > { %v3064_v39 = vpop.eup %2492  ;;  %v1031_v43 = vmul.f32 %v969_v35, %v3010_v48  ;;  %v3074_v47 = vadd.f32 1e-05, %v1142_v33  ;;  %v3084_v61 = vmul.f32 %v3010_v48, %v866_v34 }
 0x19f   : > { %v1223_v44 = vmul.f32 %v3064_v39, %v3039_v11  ;;  %v836_v50 = vpop.xlane.xlu1 %835  ;;  %vm1229_vm1 = vweird.f32 %v3064_v39 }
 0x1a0   : > { %v1095_v52 = vsub.f32 %v1031_v43, %v1063_v42  ;;  %2494 = vrsqrt.f32 %v3074_v47  ;;  %v3087_v2 = vmul.f32 %v3010_v48, %v836_v50  ;;  %v1079_v10 = vmul.f32 %v3084_v61, %v3084_v61  ;;  %vm3118_vm3 = vmor %vm1228_vm2, %vm1229_vm1 }
 0x1a1   : > { %v1224_v59 = vmul.f32 %v3064_v39, %v1223_v44  ;;  %v3114_v44 = vadd.f32 %v2868_v25, %v786_v17  ;;  %vm1388_vm5 = vweird.f32 %v3074_v47 }
 0x1a2   : > { %v1127_v63 = vmax.f32 %v1095_v52, 0.0  ;;  %1022 = vadd.xlane.f32.xlu0 %v962_v54  ;;  %855 = vadd.xlane.f32.xlu2 %v3017_v53  ;;  %v1064_v18 = vmul.f32 %v3087_v2, %v3087_v2 }
 0x1a3   : > { %v1225_v6 = vmul.f32 0.5, %v1224_v59 }
 0x1a4   : > { %v3092_v7 = vadd.f32 1e-05, %v1127_v63  ;;  %1024 = vadd.xlane.f32.xlu1 %v963_v3  ;;  %v828_v63 = vpop.f32.mrf.mxu2 }
 0x1a5   : > { %v1226_v8 = vsub.f32 1.5, %v1225_v6  ;;  %v971_v15 = vpop.xlane.xlu0 %970  ;;  %v1001_v16 = vpop.xlane.xlu2 %1000 }
 0x1a6   : > { %2496 = vrsqrt.f32 %v3092_v7  ;;  %v1032_v20 = vmul.f32 %v971_v15, %v3010_v48  ;;  %v1047_v21 = vmul.f32 %v1001_v16, %v3010_v48  ;;  %v3102_v26 = vpop.eup %2494  ;;  %vm1238_vm8 = vweird.f32 %v3092_v7 }
 0x1a7   : > { %v1227_v33 = vmul.f32 %v3064_v39, %v1226_v8  ;;  %v3108_v34 = vpop.xlane.xlu1 %972  ;;  %v1383_v35 = vmul.f32 %v3102_v26, %v3074_v47  ;;  %vm1389_vm4 = vweird.f32 %v3102_v26 }
 0x1a8   : > { %v1096_v42 = vsub.f32 %v1032_v20, %v1064_v18  ;;  %v1111_v43 = vsub.f32 %v1047_v21, %v1079_v10  ;;  %vm3179_vm6 = vmor %vm1388_vm5, %vm1389_vm4 }
 0x1a9   : > { %v1384_v29 = vmul.f32 %v3102_v26, %v1383_v35  ;;  %v1231_v11 = vsel %vm3118_vm3, %v3064_v39, %v1227_v33  ;;  %v3142_v39 = vld [vmem:[%s4234_s4] ss:$0 sm:$0xff]  ;;  %v788_v33 = vpop.f32.mrf.mxu0  ;;  %v3154_v35 = vadd.f32 %v2868_v25, %v828_v63 }
 0x1aa   : > { %v1128_v52 = vmax.f32 %v1096_v42, 0.0  ;;  %v1143_v54 = vmax.f32 %v1111_v43, 0.0  ;;  %857 = vadd.xlane.f32.xlu0 %v3105_v31  ;;  %889 = vadd.xlane.f32.xlu2 %v3067_v40  ;;  %v1542_v27 = vmul.f32 %v1231_v11, %v1158_v57  ;;  %v964_v57 = vmul.f32 %v3145_v56, %v3145_v56 }
 0x1ab   : > { %v1385_v3 = vmul.f32 0.5, %v1384_v29  ;;  %4248 = vst [vmem:[#allocation6_spill] sm:$0xff] %v3154_v35  ;;  %v3177_v63 = vadd.f32 %v2868_v25, %v788_v33  ;;  %v965_v25 = vmul.f32 %v3154_v35, %v3154_v35 }
 0x1ac   : > { %v3130_v59 = vpop.eup %2496  ;;  %v3132_v6 = vadd.f32 1e-05, %v1128_v52  ;;  %v3134_v8 = vadd.f32 1e-05, %v1143_v54  ;;  %859 = vadd.xlane.f32.xlu1 %v3114_v44  ;;  %v1578_v52 = vmul.f32 %v3142_v39, %v1542_v27  ;;  %v3167_v54 = vld [vmem:[%s4235_s5] ss:$0 sm:$0xff]  ;;  %v1174_v27 = vsub.f32 %v2877_v30, %v3042_v13 }
 0x1ad   : > { %v1233_v10 = vmul.f32 %v3130_v59, %v3092_v7  ;;  %v868_v15 = vpop.xlane.xlu0 %867  ;;  %v1003_v16 = vpop.xlane.xlu2 %1002  ;;  %v1386_v17 = vsub.f32 1.5, %v1385_v3  ;;  %4249 = vst [vmem:[#allocation7_spill] sm:$0xff] %v3177_v63  ;;  %vm1239_vm7 = vweird.f32 %v3130_v59 }
 0x1ae   : > { %2498 = vrsqrt.f32 %v3132_v6  ;;  %v3151_v20 = vmul.f32 %v3010_v48, %v868_v15  ;;  %v1048_v29 = vmul.f32 %v1003_v16, %v3010_v48  ;;  %v1159_v16 = vsub.f32 %v2880_v32, %v3057_v24  ;;  %vm3205_vm9 = vmor %vm1238_vm8, %vm1239_vm7 }
 0x1af   : > { %v1234_v18 = vmul.f32 %v3130_v59, %v1233_v10  ;;  %2500 = vrsqrt.f32 %v3134_v8  ;;  %v870_v21 = vpop.xlane.xlu1 %869  ;;  %v1387_v42 = vmul.f32 %v3102_v26, %v1386_v17  ;;  %v3201_v30 = vadd.f32 %v3167_v54, %v1578_v52 }
 0x1b0   : > { %v1080_v50 = vmul.f32 %v3151_v20, %v3151_v20  ;;  %v3171_v11 = vmul.f32 %v3010_v48, %v870_v21  ;;  %vm1398_vm10 = vweird.f32 %v3134_v8  ;;  %vm1248_vm14 = vweird.f32 %v3132_v6 }
 0x1b1   : > { %v1235_v43 = vmul.f32 0.5, %v1234_v18  ;;  %v1391_v17 = vsel %vm3179_vm6, %v3102_v26, %v1387_v42 }
 0x1b2   : > { %891 = vadd.xlane.f32.xlu0 %v3145_v56  ;;  %992 = vadd.xlane.f32.xlu2 %v947_v62  ;;  %v1112_v47 = vsub.f32 %v1048_v29, %v1080_v50  ;;  %v1081_v42 = vmul.f32 %v3171_v11, %v3171_v11  ;;  %v1558_v3 = vmul.f32 %v1391_v17, %v1174_v27 }
 0x1b3   : > { %v1236_v10 = vsub.f32 1.5, %v1235_v43  ;;  %v1646_v17 = vpack.c.bf16 %v3201_v30, %v3201_v30 }
 0x1b4   : > { %v3184_v15 = vpop.eup %2498  ;;  %893 = vadd.xlane.f32.xlu1 %v3154_v35  ;;  %v1144_v33 = vmax.f32 %v1112_v47, 0.0  ;;  %v1033_v47 = vmul.f32 %v3108_v34, %v3010_v48  ;;  %v948_v34 = vmul.f32 %v3114_v44, %v3114_v44 }
 0x1b5   : > { %v3196_v18 = vpop.eup %2500  ;;  %v1237_v21 = vmul.f32 %v3130_v59, %v1236_v10  ;;  %v1005_v32 = vpop.xlane.xlu0 %1004  ;;  %v1243_v43 = vmul.f32 %v3184_v15, %v3132_v6  ;;  %vm1249_vm13 = vweird.f32 %v3184_v15 }
 0x1b6   : > { %v838_v24 = vpop.xlane.xlu2 %837  ;;  %v1393_v26 = vmul.f32 %v3196_v18, %v3134_v8  ;;  %v1049_v7 = vmul.f32 %v1005_v32, %v3010_v48  ;;  %v3219_v50 = vadd.f32 1e-05, %v1144_v33  ;;  %v949_v33 = vmul.f32 %v3177_v63, %v3177_v63  ;;  %vm3336_vm4 = vmor %vm1248_vm14, %vm1249_vm13 }
 0x1b7   : > { %v3215_v62 = vmul.f32 %v3010_v48, %v838_v24  ;;  %v1007_v29 = vpop.xlane.xlu1 %1006  ;;  %v1241_v52 = vsel %vm3205_vm9, %v3130_v59, %v1237_v21  ;;  %v1244_v27 = vmul.f32 %v3184_v15, %v1243_v43  ;;  %v1594_v21 = vmul.f32 %v3142_v39, %v1558_v3 }
 0x1b8   : > { %v1394_v10 = vmul.f32 %v3196_v18, %v1393_v26  ;;  %v1113_v32 = vsub.f32 %v1049_v7, %v1081_v42  ;;  %2502 = vrsqrt.f32 %v3219_v50  ;;  %v1543_v59 = vmul.f32 %v1241_v52, %v1159_v16 }
 0x1b9   : > { %v1065_v24 = vmul.f32 %v3215_v62, %v3215_v62  ;;  %v1175_v16 = vsub.f32 %v2887_v36, %v3084_v61  ;;  %vm1399_vm11 = vweird.f32 %v3196_v18  ;;  %vm1408_vm15 = vweird.f32 %v3219_v50 }
 0x1ba   : > { %v1395_v35 = vmul.f32 0.5, %v1394_v10  ;;  %v1145_v56 = vmax.f32 %v1113_v32, 0.0  ;;  %1028 = vadd.xlane.f32.xlu0 %v965_v25  ;;  %1026 = vadd.xlane.f32.xlu2 %v964_v57  ;;  %v1579_v57 = vmul.f32 %v3142_v39, %v1543_v59  ;;  %v3268_v59 = vadd.f32 %v3167_v54, %v1594_v21  ;;  %vm3272_vm12 = vmor %vm1398_vm10, %vm1399_vm11 }
 0x1bb   : > { %v1097_v13 = vsub.f32 %v1033_v47, %v1065_v24  ;;  %v1762_v24 = vunpack.c.l.b16 %v1646_v17 }
 0x1bc   : > { %v1396_v26 = vsub.f32 1.5, %v1395_v35  ;;  %v3239_v42 = vadd.f32 1e-05, %v1145_v56  ;;  %996 = vadd.xlane.f32.xlu1 %v949_v33  ;;  %v1615_v32 = vadd.f32 %v3167_v54, %v1579_v57  ;;  %v1245_v33 = vmul.f32 0.5, %v1244_v27 }
 0x1bd   : > { %v1129_v7 = vmax.f32 %v1097_v13, 0.0  ;;  %v840_v52 = vpop.xlane.xlu0 %839 }
 0x1be   : > { %v975_v3 = vpop.xlane.xlu2 %974  ;;  %v1397_v56 = vmul.f32 %v3196_v18, %v1396_v26  ;;  %2504 = vrsqrt.f32 %v3239_v42  ;;  %v3256_v36 = vpop.eup %2502  ;;  %v3261_v10 = vmul.f32 %v3010_v48, %v840_v52  ;;  %v1647_v57 = vpack.c.bf16 %v1615_v32, %v1615_v32 }
 0x1bf   : > { %v3252_v35 = vadd.f32 1e-05, %v1129_v7  ;;  %v842_v47 = vpop.xlane.xlu1 %841  ;;  %v1403_v13 = vmul.f32 %v3256_v36, %v3219_v50  ;;  %v1034_v17 = vmul.f32 %v975_v3, %v3010_v48  ;;  %v2300_v8 = vpack.c.bf16 %v1615_v32, %v3201_v30 }
 0x1c0   : > { %v1066_v7 = vmul.f32 %v3261_v10, %v3261_v10  ;;  %v3280_v27 = vmul.f32 %v3010_v48, %v842_v47  ;;  %v1401_v52 = vsel %vm3272_vm12, %v3196_v18, %v1397_v56  ;;  %v1050_v3 = vmul.f32 %v1007_v29, %v3010_v48 }
 0x1c1   : > { %2506 = vrsqrt.f32 %v3252_v35  ;;  %v1404_v21 = vmul.f32 %v3256_v36, %v1403_v13  ;;  %v1763_v61 = vunpack.c.l.b16 %v1647_v57  ;;  %v1246_v13 = vsub.f32 1.5, %v1245_v33  ;;  %2301 = vst [vmem:[%s3294_s25] sm:$0xff] %v2300_v8  }
 0x1c2   : > { %994 = vadd.xlane.f32.xlu0 %v948_v34  ;;  %861 = vadd.xlane.f32.xlu2 %v3177_v63  ;;  %v1098_v47 = vsub.f32 %v1034_v17, %v1066_v7  ;;  %v1559_v30 = vmul.f32 %v1401_v52, %v1175_v16  ;;  %v1662_v18 = vpack.c.bf16 %v3268_v59, %v3268_v59  ;;  %vm1409_vm0 = vweird.f32 %v3256_v36 }
 0x1c3   : > { %v1405_v34 = vmul.f32 0.5, %v1404_v21  ;;  %v1067_v29 = vmul.f32 %v3280_v27, %v3280_v27  ;;  %v1794_v26 = vpack.c.b16 %v1763_v61, %v1762_v24  ;;  %v1247_v24 = vmul.f32 %v3184_v15, %v1246_v13  ;;  %vm3323_vm2 = vmor %vm1408_vm15, %vm1409_vm0 }
 0x1c4   : > { %v3292_v25 = vpop.eup %2504  ;;  %v1130_v32 = vmax.f32 %v1098_v47, 0.0  ;;  %v1595_v16 = vmul.f32 %v3142_v39, %v1559_v30  ;;  %vm1418_vm1 = vweird.f32 %v3239_v42  ;;  %vm1258_vm7 = vweird.f32 %v3252_v35 }
 0x1c5   : > { %v1413_v56 = vmul.f32 %v3292_v25, %v3239_v42  ;;  %v977_v7 = vpop.xlane.xlu0 %976  ;;  %v1406_v57 = vsub.f32 1.5, %v1405_v34  ;;  %1882 = vmatmul.bf16.vlgmr.msra.gmra.mxu1 %v1794_v26  ;;  %vm1419_vm3 = vweird.f32 %v3292_v25  ;;  %v1251_v6 = vsel %vm3336_vm4, %v3184_v15, %v1247_v24 }
 0x1c6   : > { %v872_v17 = vpop.xlane.xlu2 %871  ;;  %v1035_v21 = vmul.f32 %v977_v7, %v3010_v48  ;;  %v3311_v43 = vadd.f32 1e-05, %v1130_v32  ;;  %v1631_v26 = vadd.f32 %v3167_v54, %v1595_v16  ;;  %vm3349_vm6 = vmor %vm1418_vm1, %vm1419_vm3 }
 0x1c7   : > { %v2507_v33 = vpop.eup %2506  ;;  %v3305_v8 = vmul.f32 %v3010_v48, %v872_v17  ;;  %v1414_v52 = vmul.f32 %v3292_v25, %v1413_v56  ;;  %v3313_v61 = vpop.xlane.xlu1 %978  ;;  %v1407_v34 = vmul.f32 %v3256_v36, %v1406_v57 }
 0x1c8   : > { %v1253_v47 = vmul.f32 %v2507_v33, %v3252_v35  ;;  %v1099_v7 = vsub.f32 %v1035_v21, %v1067_v29  ;;  %2508 = vrsqrt.f32 %v3311_v43  ;;  %v1778_v29 = vunpack.c.l.b16 %v1662_v18 }
 0x1c9   : > { %v1082_v17 = vmul.f32 %v3305_v8, %v3305_v8  ;;  %v1415_v30 = vmul.f32 0.5, %v1414_v52  ;;  %v1411_v52 = vsel %vm3323_vm2, %v3256_v36, %v1407_v34  ;;  %v1663_v16 = vpack.c.bf16 %v1631_v26, %v1631_v26 }
 0x1ca   : > { %v1254_v63 = vmul.f32 %v2507_v33, %v1253_v47  ;;  %v1131_v32 = vmax.f32 %v1099_v7, 0.0  ;;  %v2340_v47 = vpack.c.bf16 %v1631_v26, %v3268_v59  ;;  %vm1259_vm5 = vweird.f32 %v2507_v33 }
 0x1cb   : > { %v1114_v13 = vsub.f32 %v1050_v3, %v1082_v17  ;;  %v1416_v57 = vsub.f32 1.5, %v1415_v30  ;;  %v1779_v30 = vunpack.c.l.b16 %v1663_v16  ;;  %v4262_v35 = vsub.f32 %v2906_v45, %v3151_v20  ;;  %vm1260_vm8 = vmor %vm1258_vm7, %vm1259_vm5 }
 0x1cc   : > { %v1255_v21 = vmul.f32 0.5, %v1254_v63  ;;  %v3340_v3 = vadd.f32 1e-05, %v1131_v32  ;;  %2416 = vst [vmem:[%s3294_s25 + $0x40] sm:$0xff] %v2340_v47   ;;  %v1161_v26 = vsub.f32 %v2897_v41, %v3215_v62  ;;  %v4264_v62 = vsub.f32 %v2911_v49, %v3171_v11 }
 0x1cd   : > { %v1146_v18 = vmax.f32 %v1114_v13, 0.0  ;;  %v1417_v63 = vmul.f32 %v3292_v25, %v1416_v57  ;;  %v874_v36 = vpop.xlane.xlu0 %873  ;;  %v1560_v24 = vmul.f32 %v1411_v52, %v4262_v35  ;;  %vm1268_vm9 = vweird.f32 %v3311_v43 }
 0x1ce   : > { %v1256_v7 = vsub.f32 1.5, %v1255_v21  ;;  %v1009_v34 = vpop.xlane.xlu2 %1008  ;;  %2510 = vrsqrt.f32 %v3340_v3  ;;  %v3358_v56 = vpop.eup %2508  ;;  %v3361_v13 = vmul.f32 %v3010_v48, %v874_v36  ;;  %v4263_v21 = vsub.f32 %v2892_v38, %v3087_v2 }
 0x1cf   : > { %v3355_v59 = vadd.f32 1e-05, %v1146_v18  ;;  %v876_v15 = vpop.xlane.xlu1 %875  ;;  %v1421_v42 = vsel %vm3349_vm6, %v3292_v25, %v1417_v63  ;;  %v1263_v57 = vmul.f32 %v3358_v56, %v3311_v43  ;;  %v1802_v25 = vpack.c.b16 %v1779_v30, %v1778_v29 }
 0x1d0   : > { %v1257_v32 = vmul.f32 %v2507_v33, %v1256_v7  ;;  %v1544_v50 = vmul.f32 %v1251_v6, %v4263_v21  ;;  %v1083_v45 = vmul.f32 %v3361_v13, %v3361_v13  ;;  %v1051_v20 = vmul.f32 %v1009_v34, %v3010_v48 }
 0x1d1   : > { %2512 = vrsqrt.f32 %v3355_v59  ;;  %v3382_v41 = vmul.f32 %v3010_v48, %v876_v15  ;;  %v1561_v16 = vmul.f32 %v1421_v42, %v4264_v62  ;;  %1922 = vmatmul.bf16.vlgmr.msra.gmra.mxu3 %v1802_v25  ;;  %v1596_v38 = vmul.f32 %v3142_v39, %v1560_v24 }
 0x1d2   : > { %v1261_v18 = vsel %vm1260_vm8, %v2507_v33, %v1257_v32  ;;  %v1115_v47 = vsub.f32 %v1051_v20, %v1083_v45  ;;  %v1264_v33 = vmul.f32 %v3358_v56, %v1263_v57  ;;  %v1580_v6 = vmul.f32 %v3142_v39, %v1544_v50 }
 0x1d3   : > { %v1545_v52 = vmul.f32 %v1261_v18, %v1161_v26  ;;  %v1084_v11 = vmul.f32 %v3382_v41, %v3382_v41  ;;  %v1597_v32 = vmul.f32 %v3142_v39, %v1561_v16  ;;  %v1632_v26 = vadd.f32 %v3167_v54, %v1596_v38 }
 0x1d4   : > { %v3388_v2 = vpop.eup %2510  ;;  %v1147_v7 = vmax.f32 %v1115_v47, 0.0  ;;  %v1265_v57 = vmul.f32 0.5, %v1264_v33  ;;  %v1036_v21 = vmul.f32 %v3313_v61, %v3010_v48  ;;  %v1162_v18 = vsub.f32 %v2924_v55, %v3261_v10 }
 0x1d5   : > { %v1581_v29 = vmul.f32 %v3142_v39, %v1545_v52  ;;  %v1273_v63 = vmul.f32 %v3388_v2, %v3340_v3  ;;  %v1011_v36 = vpop.xlane.xlu0 %1010  ;;  %v1633_v16 = vadd.f32 %v3167_v54, %v1597_v32  ;;  %v1664_v61 = vpack.c.bf16 %v1632_v26, %v1632_v26 }
 0x1d6   : > { %v844_v34 = vpop.xlane.xlu2 %843  ;;  %v1052_v17 = vmul.f32 %v1011_v36, %v3010_v48  ;;  %v3407_v35 = vadd.f32 1e-05, %v1147_v7  ;;  %v1616_v38 = vadd.f32 %v3167_v54, %v1580_v6  ;;  %vm1269_vm10 = vweird.f32 %v3358_v56 }
 0x1d7   : > { %v3395_v49 = vpop.eup %2512  ;;  %v3401_v30 = vmul.f32 %v3010_v48, %v844_v34  ;;  %v1274_v15 = vmul.f32 %v3388_v2, %v1273_v63  ;;  %v3409_v24 = vpop.xlane.xlu1 %1012  ;;  %v1617_v33 = vadd.f32 %v3167_v54, %v1581_v29  ;;  %v1266_v63 = vsub.f32 1.5, %v1265_v57  ;;  %vm3453_vm13 = vmor %vm1268_vm9, %vm1269_vm10 }
 0x1d8   : > { %v1423_v42 = vmul.f32 %v3395_v49, %v3355_v59  ;;  %2514 = vrsqrt.f32 %v3407_v35  ;;  %v1116_v45 = vsub.f32 %v1052_v17, %v1084_v11  ;;  %v1665_v36 = vpack.c.bf16 %v1633_v16, %v1633_v16 }
 0x1d9   : > { %v1068_v50 = vmul.f32 %v3401_v30, %v3401_v30  ;;  %v1275_v52 = vmul.f32 0.5, %v1274_v15  ;;  %v2345_v34 = vpack.c.bf16 %v1633_v16, %v1632_v26  ;;  %vm1279_vm11 = vweird.f32 %v3388_v2 }
 0x1da   : > { %v1424_v25 = vmul.f32 %v3395_v49, %v1423_v42  ;;  %v1148_v11 = vmax.f32 %v1116_v45, 0.0  ;;  %v1781_v6 = vunpack.c.l.b16 %v1665_v36  ;;  %v1780_v57 = vunpack.c.l.b16 %v1664_v61 }
 0x1db   : > { %v1100_v62 = vsub.f32 %v1036_v21, %v1068_v50  ;;  %v1276_v15 = vsub.f32 1.5, %v1275_v52  ;;  %2417 = vst [vmem:[%s3294_s25 + $0x48] sm:$0xff] %v2345_v34   ;;  %v1648_v50 = vpack.c.bf16 %v1616_v38, %v1616_v38  ;;  %v1267_v16 = vmul.f32 %v3358_v56, %v1266_v63 }
 0x1dc   : > { %v1425_v47 = vmul.f32 0.5, %v1424_v25  ;;  %v1649_v25 = vpack.c.bf16 %v1617_v33, %v1617_v33  ;;  %vm1429_vm12 = vweird.f32 %v3395_v49  ;;  %v3441_v52 = vadd.f32 1e-05, %v1148_v11 }
 0x1dd   : > { %v1132_v7 = vmax.f32 %v1100_v62, 0.0  ;;  %v846_v17 = vpop.xlane.xlu0 %845  ;;  %v1277_v36 = vmul.f32 %v3388_v2, %v1276_v15  ;;  %v1178_v15 = vsub.f32 %v2916_v51, %v3305_v8  ;;  %vm1428_vm14 = vweird.f32 %v3355_v59 }
 0x1de   : > { %v981_v32 = vpop.xlane.xlu2 %980  ;;  %v1426_v42 = vsub.f32 1.5, %v1425_v47  ;;  %v3431_v29 = vpop.eup %2514  ;;  %v3434_v26 = vmul.f32 %v3010_v48, %v846_v17  ;;  %v1803_v47 = vpack.c.b16 %v1781_v6, %v1780_v57  ;;  %v2305_v17 = vpack.c.bf16 %v1617_v33, %v1616_v38  ;;  %vm3470_vm0 = vmor %vm1428_vm14, %vm1429_vm12 }
 0x1df   : > { %v3428_v21 = vadd.f32 1e-05, %v1132_v7  ;;  %v848_v62 = vpop.xlane.xlu1 %847  ;;  %v1433_v45 = vmul.f32 %v3431_v29, %v3407_v35  ;;  %v1037_v7 = vmul.f32 %v981_v32, %v3010_v48  ;;  %v1764_v57 = vunpack.c.l.b16 %v1648_v50 }
 0x1e0   : > { %v1069_v61 = vmul.f32 %v3434_v26, %v3434_v26  ;;  %v1427_v63 = vmul.f32 %v3395_v49, %v1426_v42  ;;  %v1765_v20 = vunpack.c.l.b16 %v1649_v25  ;;  %v3458_v32 = vmul.f32 %v3010_v48, %v848_v62  ;;  %2409 = vst [vmem:[%s3294_s25 + $0x8] sm:$0xff] %v2305_v17  }
 0x1e1   : > { %2516 = vrsqrt.f32 %v3428_v21  ;;  %v1434_v34 = vmul.f32 %v3431_v29, %v1433_v45  ;;  %1927 = vmatmul.bf16.gmra.mxu3 %v1803_v47  ;;  %v1271_v43 = vsel %vm3453_vm13, %v3358_v56, %v1267_v16  ;;  %vm1278_vm15 = vweird.f32 %v3340_v3 }
 0x1e2   : > { %v1101_v6 = vsub.f32 %v1037_v7, %v1069_v61  ;;  %2518 = vrsqrt.f32 %v3441_v52  ;;  %v1795_v51 = vpack.c.b16 %v1765_v20, %v1764_v57  ;;  %vm3479_vm1 = vmor %vm1278_vm15, %vm1279_vm11  ;;  %v1431_v3 = vsel %vm3470_vm0, %v3395_v49, %v1427_v63 }
 0x1e3   : > { %v1435_v38 = vmul.f32 0.5, %v1434_v34  ;;  %v1070_v62 = vmul.f32 %v3458_v32, %v3458_v32  ;;  %v1281_v61 = vsel %vm3479_vm1, %v3388_v2, %v1277_v36  ;;  %v1546_v49 = vmul.f32 %v1271_v43, %v1162_v18 }
 0x1e4   : > { %v1133_v42 = vmax.f32 %v1101_v6, 0.0  ;;  %1887 = vmatmul.bf16.gmra.mxu1 %v1795_v51  ;;  %vm1439_vm2 = vweird.f32 %v3431_v29  ;;  %vm1438_vm3 = vweird.f32 %v3407_v35  ;;  %v1053_v11 = vmul.f32 %v3409_v24, %v3010_v48 }
 0x1e5   : > { %v983_v8 = vpop.xlane.xlu0 %982  ;;  %v1436_v25 = vsub.f32 1.5, %v1435_v38  ;;  %v1562_v2 = vmul.f32 %v1431_v3, %v1178_v15  ;;  %v4271_v18 = vsub.f32 %v2929_v58, %v3280_v27  ;;  %vm3518_vm4 = vmor %vm1438_vm3, %vm1439_vm2  ;;  %v1582_v24 = vmul.f32 %v3142_v39, %v1546_v49 }
 0x1e6   : > { %v878_v59 = vpop.xlane.xlu2 %877  ;;  %v1038_v20 = vmul.f32 %v983_v8, %v3010_v48  ;;  %v3491_v45 = vadd.f32 1e-05, %v1133_v42  ;;  %v1179_v58 = vsub.f32 %v2942_v1, %v3361_v13  ;;  %vm1288_vm6 = vweird.f32 %v3428_v21 }
 0x1e7   : > { %v3475_v50 = vpop.eup %2516  ;;  %v3493_v47 = vpop.xlane.xlu1 %984  ;;  %v1437_v7 = vmul.f32 %v3431_v29, %v1436_v25  ;;  %v3504_v34 = vmul.f32 %v3010_v48, %v878_v59  ;;  %v1547_v36 = vmul.f32 %v1281_v61, %v4271_v18  ;;  %v1618_v8 = vadd.f32 %v3167_v54, %v1582_v24 }
 0x1e8   : > { %v1283_v16 = vmul.f32 %v3475_v50, %v3428_v21  ;;  %v1102_v63 = vsub.f32 %v1038_v20, %v1070_v62  ;;  %2520 = vrsqrt.f32 %v3491_v45  ;;  %v3516_v6 = vpop.eup %2518  ;;  %v1598_v59 = vmul.f32 %v3142_v39, %v1562_v2 }
 0x1e9   : > { %v1085_v10 = vmul.f32 %v3504_v34, %v3504_v34  ;;  %v1583_v15 = vmul.f32 %v3142_v39, %v1547_v36  ;;  %v1441_v43 = vsel %vm3518_vm4, %v3431_v29, %v1437_v7  ;;  %v1443_v56 = vmul.f32 %v3516_v6, %v3441_v52 }
 0x1ea   : > { %v1284_v17 = vmul.f32 %v3475_v50, %v1283_v16  ;;  %v1134_v55 = vmax.f32 %v1102_v63, 0.0  ;;  %vm1289_vm5 = vweird.f32 %v3475_v50  ;;  %v1650_v13 = vpack.c.bf16 %v1618_v8, %v1618_v8 }
 0x1eb   : > { %v1117_v38 = vsub.f32 %v1053_v11, %v1085_v10  ;;  %v1619_v1 = vadd.f32 %v3167_v54, %v1583_v15  ;;  %v1563_v20 = vmul.f32 %v1441_v43, %v1179_v58  ;;  %v1180_v2 = vsub.f32 %v2947_v0, %v3382_v41  ;;  %vm3558_vm7 = vmor %vm1288_vm6, %vm1289_vm5 }
 0x1ec   : > { %v1285_v57 = vmul.f32 0.5, %v1284_v17  ;;  %v3529_v33 = vadd.f32 1e-05, %v1134_v55  ;;  %v1766_v36 = vunpack.c.l.b16 %v1650_v13  ;;  %v1444_v24 = vmul.f32 %v3516_v6, %v1443_v56 }
 0x1ed   : > { %v880_v42 = vpop.xlane.xlu0 %879  ;;  %v1149_v3 = vmax.f32 %v1117_v38, 0.0  ;;  %v1651_v17 = vpack.c.bf16 %v1619_v1, %v1619_v1  ;;  %v2310_v11 = vpack.c.bf16 %v1619_v1, %v1618_v8  ;;  %v1599_v15 = vmul.f32 %v3142_v39, %v1563_v20 }
 0x1ee   : > { %v1286_v27 = vsub.f32 1.5, %v1285_v57  ;;  %v1015_v51 = vpop.xlane.xlu2 %1014  ;;  %v3536_v25 = vmul.f32 %v3010_v48, %v880_v42  ;;  %v3538_v29 = vpop.eup %2520  ;;  %2522 = vrsqrt.f32 %v3529_v33  ;;  %v1164_v43 = vsub.f32 %v2934_v60, %v3401_v30 }
 0x1ef   : > { %v882_v62 = vpop.xlane.xlu1 %881  ;;  %v1293_v61 = vmul.f32 %v3538_v29, %v3491_v45  ;;  %v3545_v49 = vadd.f32 1e-05, %v1149_v3  ;;  %v1054_v63 = vmul.f32 %v1015_v51, %v3010_v48  ;;  %2410 = vst [vmem:[%s3294_s25 + $0x10] sm:$0xff] %v2310_v11   ;;  %v1767_v35 = vunpack.c.l.b16 %v1651_v17 }
 0x1f0   : > { %v1287_v16 = vmul.f32 %v3475_v50, %v1286_v27  ;;  %v1086_v7 = vmul.f32 %v3536_v25, %v3536_v25  ;;  %v3564_v57 = vmul.f32 %v3010_v48, %v882_v62  ;;  %v1634_v8 = vadd.f32 %v3167_v54, %v1598_v59 }
 0x1f1   : > { %v1294_v55 = vmul.f32 %v3538_v29, %v1293_v61  ;;  %2524 = vrsqrt.f32 %v3545_v49  ;;  %v1796_v27 = vpack.c.b16 %v1767_v35, %v1766_v36  ;;  %v1165_v3 = vsub.f32 %v2960_v9, %v3434_v26 }
 0x1f2   : > { %v1118_v18 = vsub.f32 %v1054_v63, %v1086_v7  ;;  %v1291_v21 = vsel %vm3558_vm7, %v3475_v50, %v1287_v16  ;;  %v1087_v1 = vmul.f32 %v3564_v57, %v3564_v57  ;;  %v1635_v30 = vadd.f32 %v3167_v54, %v1599_v15 }
 0x1f3   : > { %v1295_v38 = vmul.f32 0.5, %v1294_v55  ;;  %v1548_v62 = vmul.f32 %v1291_v21, %v1164_v43  ;;  %v1445_v26 = vmul.f32 0.5, %v1444_v24  ;;  %vm1299_vm8 = vweird.f32 %v3538_v29 }
 0x1f4   : > { %v1150_v58 = vmax.f32 %v1118_v18, 0.0  ;;  %v3579_v13 = vpop.eup %2522  ;;  %1892 = vmatmul.bf16.gmra.mxu1 %v1796_v27  ;;  %vm1298_vm9 = vweird.f32 %v3491_v45  ;;  %v1039_v63 = vmul.f32 %v3493_v47, %v3010_v48  ;;  %v1666_v17 = vpack.c.bf16 %v1634_v8, %v1634_v8 }
 0x1f5   : > { %v1017_v42 = vpop.xlane.xlu0 %1016  ;;  %v1296_v56 = vsub.f32 1.5, %v1295_v38  ;;  %v1303_v11 = vmul.f32 %v3579_v13, %v3529_v33  ;;  %v1584_v18 = vmul.f32 %v3142_v39, %v1548_v62  ;;  %vm1300_vm10 = vmor %vm1298_vm9, %vm1299_vm8  ;;  %v1667_v36 = vpack.c.bf16 %v1635_v30, %v1635_v30 }
 0x1f6   : > { %v850_v51 = vpop.xlane.xlu2 %849  ;;  %v1055_v50 = vmul.f32 %v1017_v42, %v3010_v48  ;;  %v3581_v20 = vadd.f32 1e-05, %v1150_v58  ;;  %v2350_v35 = vpack.c.bf16 %v1635_v30, %v1634_v8  ;;  %v1446_v24 = vsub.f32 1.5, %v1445_v26 }
 0x1f7   : > { %v3584_v60 = vmul.f32 %v3010_v48, %v850_v51  ;;  %v3587_v59 = vpop.xlane.xlu1 %1018  ;;  %v2525_v9 = vpop.eup %2524  ;;  %v1297_v16 = vmul.f32 %v3538_v29, %v1296_v56  ;;  %v1782_v43 = vunpack.c.l.b16 %v1666_v17  ;;  %v1783_v58 = vunpack.c.l.b16 %v1667_v36 }
 0x1f8   : > { %v1119_v61 = vsub.f32 %v1055_v50, %v1087_v1  ;;  %v1453_v7 = vmul.f32 %v2525_v9, %v3545_v49  ;;  %2526 = vrsqrt.f32 %v3581_v20  ;;  %2418 = vst [vmem:[%s3294_s25 + $0x50] sm:$0xff] %v2350_v35   ;;  %v1304_v56 = vmul.f32 %v3579_v13, %v1303_v11 }
 0x1f9   : > { %v1071_v10 = vmul.f32 %v3584_v60, %v3584_v60  ;;  %v1301_v38 = vsel %vm1300_vm10, %v3538_v29, %v1297_v16  ;;  %vm1459_vm11 = vweird.f32 %v2525_v9  ;;  %v1804_v62 = vpack.c.b16 %v1783_v58, %v1782_v43 }
 0x1fa   : > { %v1151_v55 = vmax.f32 %v1119_v61, 0.0  ;;  %v1454_v45 = vmul.f32 %v2525_v9, %v1453_v7  ;;  %v1549_v51 = vmul.f32 %v1301_v38, %v1165_v3  ;;  %v1620_v29 = vadd.f32 %v3167_v54, %v1584_v18 }
 0x1fb   : > { %v1103_v47 = vsub.f32 %v1039_v63, %v1071_v10  ;;  %v1181_v63 = vsub.f32 %v2952_v5, %v3504_v34  ;;  %vm1458_vm12 = vweird.f32 %v3545_v49  ;;  %1932 = vmatmul.bf16.gmra.mxu3 %v1804_v62  ;;  %vm1449_vm14 = vweird.f32 %v3516_v6 }
 0x1fc   : > { %v3601_v21 = vadd.f32 1e-05, %v1151_v55  ;;  %v1455_v15 = vmul.f32 0.5, %v1454_v45  ;;  %v1585_v26 = vmul.f32 %v3142_v39, %v1549_v51  ;;  %v1305_v55 = vmul.f32 0.5, %v1304_v56  ;;  %vm1460_vm13 = vmor %vm1458_vm12, %vm1459_vm11 }
 0x1fd   : > { %v852_v27 = vpop.xlane.xlu0 %851  ;;  %v1135_v1 = vmax.f32 %v1103_v47, 0.0  ;;  %v1652_v34 = vpack.c.bf16 %v1620_v29, %v1620_v29  ;;  %v1447_v49 = vmul.f32 %v3516_v6, %v1446_v24  ;;  %vm1448_vm15 = vweird.f32 %v3441_v52 }
 0x1fe   : > { %v987_v42 = vpop.xlane.xlu2 %986  ;;  %v3607_v50 = vmul.f32 %v3010_v48, %v852_v27  ;;  %v1456_v8 = vsub.f32 1.5, %v1455_v15  ;;  %v3611_v16 = vpop.eup %2526  ;;  %2528 = vrsqrt.f32 %v3601_v21  ;;  %v1621_v11 = vadd.f32 %v3167_v54, %v1585_v26  ;;  %vm3646_vm0 = vmor %vm1448_vm15, %vm1449_vm14 }
 0x1ff   : > { %v854_v30 = vpop.xlane.xlu1 %853  ;;  %v3614_v61 = vadd.f32 1e-05, %v1135_v1  ;;  %v1040_v7 = vmul.f32 %v987_v42, %v3010_v48  ;;  %v1463_v5 = vmul.f32 %v3611_v16, %v3581_v20  ;;  %v1166_v38 = vsub.f32 %v2965_v12, %v3458_v32 }
 0x200   : > { %v1072_v3 = vmul.f32 %v3607_v50, %v3607_v50  ;;  %v1457_v17 = vmul.f32 %v2525_v9, %v1456_v8  ;;  %v3626_v18 = vmul.f32 %v3010_v48, %v854_v30  ;;  %v1653_v47 = vpack.c.bf16 %v1621_v11, %v1621_v11 }
 0x201   : > { %2530 = vrsqrt.f32 %v3614_v61  ;;  %v1182_v15 = vsub.f32 %v2978_v19, %v3536_v25  ;;  %v2315_v58 = vpack.c.bf16 %v1621_v11, %v1620_v29  ;;  %v1306_v42 = vsub.f32 1.5, %v1305_v55 }
 0x202   : > { %v1104_v10 = vsub.f32 %v1040_v7, %v1072_v3  ;;  %v1461_v45 = vsel %vm1460_vm13, %v2525_v9, %v1457_v17  ;;  %v1073_v24 = vmul.f32 %v3626_v18, %v3626_v18  ;;  %v1464_v1 = vmul.f32 %v3611_v16, %v1463_v5 }
 0x203   : > { %v1565_v36 = vmul.f32 %v1461_v45, %v1181_v63  ;;  %2411 = vst [vmem:[%s3294_s25 + $0x18] sm:$0xff] %v2315_v58   ;;  %v1768_v62 = vunpack.c.l.b16 %v1652_v34  ;;  %v1769_v30 = vunpack.c.l.b16 %v1653_v47  ;;  %vm1308_vm1 = vweird.f32 %v3529_v33 }
 0x204   : > { %v1136_v35 = vmax.f32 %v1104_v10, 0.0  ;;  %v3637_v27 = vpop.eup %2528  ;;  %v1451_v63 = vsel %vm3646_vm0, %v3516_v6, %v1447_v49  ;;  %v1056_v55 = vmul.f32 %v3587_v59, %v3010_v48  ;;  %vm1309_vm2 = vweird.f32 %v3579_v13 }
 0x205   : > { %v989_v43 = vpop.xlane.xlu0 %988  ;;  %v1601_v3 = vmul.f32 %v3142_v39, %v1565_v36  ;;  %v1473_v17 = vmul.f32 %v3637_v27, %v3601_v21  ;;  %v1183_v45 = vsub.f32 %v2983_v23, %v3564_v57  ;;  %v1797_v34 = vpack.c.b16 %v1769_v30, %v1768_v62  ;;  %vm3703_vm7 = vmor %vm1308_vm1, %vm1309_vm2 }
 0x206   : > { %v884_v9 = vpop.xlane.xlu2 %883  ;;  %v3639_v51 = vadd.f32 1e-05, %v1136_v35  ;;  %v1041_v56 = vmul.f32 %v989_v43, %v3010_v48  ;;  %v1465_v36 = vmul.f32 0.5, %v1464_v1  ;;  %v1564_v35 = vmul.f32 %v1451_v63, %v1180_v2 }
 0x207   : > { %v3652_v8 = vmul.f32 %v3010_v48, %v884_v9  ;;  %v3655_v26 = vpop.xlane.xlu1 %990  ;;  %v2531_v29 = vpop.eup %2530  ;;  %v1307_v47 = vmul.f32 %v3579_v13, %v1306_v42  ;;  %v1167_v59 = vsub.f32 %v2970_v14, %v3584_v60  ;;  %1897 = vmatmul.bf16.gmra.mxu1 %v1797_v34  ;;  %v1637_v9 = vadd.f32 %v3167_v54, %v1601_v3 }
 0x208   : > { %2532 = vrsqrt.f32 %v3639_v51  ;;  %v1105_v7 = vsub.f32 %v1041_v56, %v1073_v24  ;;  %v1313_v11 = vmul.f32 %v2531_v29, %v3614_v61  ;;  %v1474_v58 = vmul.f32 %v3637_v27, %v1473_v17 }
 0x209   : > { %v1088_v10 = vmul.f32 %v3652_v8, %v3652_v8  ;;  %v1600_v62 = vmul.f32 %v3142_v39, %v1564_v35  ;;  %vm1468_vm3 = vweird.f32 %v3581_v20  ;;  %vm1469_vm4 = vweird.f32 %v3611_v16 }
 0x20a   : > { %v1137_v5 = vmax.f32 %v1105_v7, 0.0  ;;  %v1314_v6 = vmul.f32 %v2531_v29, %v1313_v11  ;;  %vm1318_vm5 = vweird.f32 %v3614_v61  ;;  %v1466_v41 = vsub.f32 1.5, %v1465_v36  ;;  %vm3742_vm11 = vmor %vm1468_vm3, %vm1469_vm4 }
 0x20b   : > { %v1120_v49 = vsub.f32 %v1056_v55, %v1088_v10  ;;  %vm1319_vm6 = vweird.f32 %v2531_v29  ;;  %v1636_v3 = vadd.f32 %v3167_v54, %v1600_v62  ;;  %v1669_v7 = vpack.c.bf16 %v1637_v9, %v1637_v9 }
 0x20c   : > { %v3679_v43 = vadd.f32 1e-05, %v1137_v5  ;;  %v1315_v24 = vmul.f32 0.5, %v1314_v6  ;;  %v1475_v17 = vmul.f32 0.5, %v1474_v58  ;;  %vm1320_vm8 = vmor %vm1318_vm5, %vm1319_vm6  ;;  %vm1478_vm9 = vweird.f32 %v3601_v21 }
 0x20d   : > { %v1152_v56 = vmax.f32 %v1120_v49, 0.0  ;;  %v886_v52 = vpop.xlane.xlu0 %885  ;;  %v1668_v10 = vpack.c.bf16 %v1636_v3, %v1636_v3  ;;  %v2355_v5 = vpack.c.bf16 %v1637_v9, %v1636_v3  ;;  %v1785_v34 = vunpack.c.l.b16 %v1669_v7 }
 0x20e   : > { %v1021_v1 = vpop.xlane.xlu2 %1020  ;;  %v3684_v0 = vpop.eup %2532  ;;  %2534 = vrsqrt.f32 %v3679_v43  ;;  %v3691_v14 = vmul.f32 %v3010_v48, %v886_v52  ;;  %v1316_v2 = vsub.f32 1.5, %v1315_v24  ;;  %v1168_v36 = vsub.f32 %v2996_v37, %v3607_v50 }
 0x20f   : > { %v3693_v60 = vadd.f32 1e-05, %v1152_v56  ;;  %v888_v42 = vpop.xlane.xlu1 %887  ;;  %v1057_v30 = vmul.f32 %v1021_v1, %v3010_v48  ;;  %v1323_v55 = vmul.f32 %v3684_v0, %v3639_v51  ;;  %v1311_v49 = vsel %vm3703_vm7, %v3579_v13, %v1307_v47  ;;  %2419 = vst [vmem:[%s3294_s25 + $0x58] sm:$0xff] %v2355_v5  }
 0x210   : > { %v1089_v39 = vmul.f32 %v3691_v14, %v3691_v14  ;;  %v1317_v11 = vmul.f32 %v2531_v29, %v1316_v2  ;;  %v3716_v6 = vmul.f32 %v3010_v48, %v888_v42  ;;  %v1467_v61 = vmul.f32 %v3611_v16, %v1466_v41 }
 0x211   : > { %2536 = vrsqrt.f32 %v3693_v60  ;;  %v1784_v24 = vunpack.c.l.b16 %v1668_v10  ;;  %v1476_v56 = vsub.f32 1.5, %v1475_v17  ;;  %vm1479_vm10 = vweird.f32 %v3637_v27 }
 0x212   : > { %v1121_v54 = vsub.f32 %v1057_v30, %v1089_v39  ;;  %v1321_v33 = vsel %vm1320_vm8, %v2531_v29, %v1317_v11  ;;  %v1324_v29 = vmul.f32 %v3684_v0, %v1323_v55  ;;  %v1169_v52 = vsub.f32 %v3007_v46, %v3626_v18  ;;  %v3749_v39 = vld [vmem:[%s4234_s4] ss:$0 sm:$0xff]  ;;  %vm3786_vm12 = vmor %vm1478_vm9, %vm1479_vm10 }
 0x213   : > { %v1551_v58 = vmul.f32 %v1321_v33, %v1167_v59  ;;  %v1805_v41 = vpack.c.b16 %v1785_v34, %v1784_v24  ;;  %v1550_v59 = vmul.f32 %v1311_v49, %v1166_v38  ;;  %v1090_v12 = vmul.f32 %v3716_v6, %v3716_v6 }
 0x214   : > { %v3721_v35 = vpop.eup %2534  ;;  %v1153_v9 = vmax.f32 %v1121_v54, 0.0  ;;  %v1042_v7 = vmul.f32 %v3655_v26, %v3010_v48  ;;  %v1471_v63 = vsel %vm3742_vm11, %v3611_v16, %v1467_v61  ;;  %v1477_v17 = vmul.f32 %v3637_v27, %v1476_v56  ;;  %v3779_v61 = vld [vmem:[%s4235_s5] ss:$0 sm:$0xff] }
 0x215   : > { %v1023_v1 = vpop.xlane.xlu0 %1022  ;;  %v1333_v13 = vmul.f32 %v3721_v35, %v3679_v43  ;;  %v1587_v30 = vmul.f32 %v3749_v39, %v1551_v58  ;;  %1937 = vmatmul.bf16.gmra.mxu3 %v1805_v41  ;;  %v1325_v11 = vmul.f32 0.5, %v1324_v29  ;;  %v1184_v5 = vsub.f32 %v2988_v28, %v3652_v8 }
 0x216   : > { %v856_v62 = vpop.xlane.xlu2 %855  ;;  %v3731_v47 = vadd.f32 1e-05, %v1153_v9  ;;  %v1058_v32 = vmul.f32 %v1023_v1, %v3010_v48  ;;  %v1586_v34 = vmul.f32 %v3749_v39, %v1550_v59  ;;  %v1185_v33 = vsub.f32 %v3034_v4, %v3691_v14 }
 0x217   : > { %v3736_v2 = vpop.eup %2536  ;;  %v3756_v38 = vmul.f32 %v3010_v48, %v856_v62  ;;  %v1025_v20 = vpop.xlane.xlu1 %1024  ;;  %v1334_v10 = vmul.f32 %v3721_v35, %v1333_v13  ;;  %v1623_v58 = vadd.f32 %v3779_v61, %v1587_v30  ;;  %vm1329_vm13 = vweird.f32 %v3684_v0 }
 0x218   : > { %v1483_v3 = vmul.f32 %v3736_v2, %v3693_v60  ;;  %2538 = vrsqrt.f32 %v3731_v47  ;;  %v1122_v55 = vsub.f32 %v1058_v32, %v1090_v12  ;;  %vm1488_vm14 = vweird.f32 %v3693_v60 }
 0x219   : > { %v1074_v54 = vmul.f32 %v3756_v38, %v3756_v38  ;;  %v1622_v56 = vadd.f32 %v3779_v61, %v1586_v34  ;;  %v1566_v29 = vmul.f32 %v1471_v63, %v1182_v15  ;;  %v1326_v1 = vsub.f32 1.5, %v1325_v11 }
 0x21a   : > { %v1484_v26 = vmul.f32 %v3736_v2, %v1483_v3  ;;  %v1154_v16 = vmax.f32 %v1122_v55, 0.0  ;;  %v1481_v59 = vsel %vm3786_vm12, %v3637_v27, %v1477_v17  ;;  %vm1328_vm15 = vweird.f32 %v3639_v51 }
 0x21b   : > { %v1106_v49 = vsub.f32 %v1042_v7, %v1074_v54  ;;  %v1335_v30 = vmul.f32 0.5, %v1334_v10  ;;  %vm1489_vm0 = vweird.f32 %v3736_v2  ;;  %v1654_v15 = vpack.c.bf16 %v1622_v56, %v1622_v56  ;;  %vm3859_vm4 = vmor %vm1328_vm15, %vm1329_vm13 }
 0x21c   : > { %v1485_v24 = vmul.f32 0.5, %v1484_v26  ;;  %v3796_v62 = vadd.f32 1e-05, %v1154_v16  ;;  %v1655_v32 = vpack.c.bf16 %v1623_v58, %v1623_v58  ;;  %v1567_v63 = vmul.f32 %v1481_v59, %v1183_v45  ;;  %vm3833_vm3 = vmor %vm1488_vm14, %vm1489_vm0 }
 0x21d   : > { %v1138_v13 = vmax.f32 %v1106_v49, 0.0  ;;  %v858_v21 = vpop.xlane.xlu0 %857  ;;  %v1602_v17 = vmul.f32 %v3749_v39, %v1566_v29  ;;  %vm1338_vm1 = vweird.f32 %v3679_v43  ;;  %v1059_v55 = vmul.f32 %v1025_v20, %v3010_v48 }
 0x21e   : > { %v890_v41 = vpop.xlane.xlu2 %889  ;;  %v3801_v42 = vpop.eup %2538  ;;  %v1486_v12 = vsub.f32 1.5, %v1485_v24  ;;  %2540 = vrsqrt.f32 %v3796_v62  ;;  %v2320_v10 = vpack.c.bf16 %v1623_v58, %v1622_v56  ;;  %v1336_v26 = vsub.f32 1.5, %v1335_v30 }
 0x21f   : > { %v3806_v19 = vmul.f32 %v3010_v48, %v890_v41  ;;  %v1493_v25 = vmul.f32 %v3801_v42, %v3731_v47  ;;  %v3811_v3 = vpop.xlane.xlu1 %859  ;;  %v3814_v7 = vadd.f32 1e-05, %v1138_v13  ;;  %vm1339_vm2 = vweird.f32 %v3721_v35 }
 0x220   : > { %v1487_v27 = vmul.f32 %v3736_v2, %v1486_v12  ;;  %v1186_v34 = vsub.f32 %v3054_v22, %v3716_v6  ;;  %v3838_v57 = vmul.f32 %v3010_v48, %v858_v21  ;;  %2412 = vst [vmem:[%s3294_s25 + $0x20] sm:$0xff] %v2320_v10   ;;  %v1770_v20 = vunpack.c.l.b16 %v1654_v15  ;;  %vm3887_vm7 = vmor %vm1338_vm1, %vm1339_vm2 }
 0x221   : > { %v1494_v11 = vmul.f32 %v3801_v42, %v1493_v25  ;;  %v1091_v54 = vmul.f32 %v3806_v19, %v3806_v19  ;;  %2542 = vrsqrt.f32 %v3814_v7  ;;  %v1771_v16 = vunpack.c.l.b16 %v1655_v32 }
 0x222   : > { %v1327_v49 = vmul.f32 %v3684_v0, %v1326_v1  ;;  %v1491_v58 = vsel %vm3833_vm3, %v3736_v2, %v1487_v27  ;;  %v1603_v9 = vmul.f32 %v3749_v39, %v1567_v63  ;;  %v1638_v60 = vadd.f32 %v3779_v61, %v1602_v17 }
 0x223   : > { %v1123_v45 = vsub.f32 %v1059_v55, %v1091_v54  ;;  %v1495_v56 = vmul.f32 0.5, %v1494_v11  ;;  %v1170_v29 = vsub.f32 %v3017_v53, %v3756_v38  ;;  %v1798_v21 = vpack.c.b16 %v1771_v16, %v1770_v20 }
 0x224   : > { %v3847_v24 = vpop.eup %2540  ;;  %v1337_v1 = vmul.f32 %v3721_v35, %v1336_v26  ;;  %v1639_v2 = vadd.f32 %v3779_v61, %v1603_v9  ;;  %v1670_v12 = vpack.c.bf16 %v1638_v60, %v1638_v60  ;;  %v1568_v15 = vmul.f32 %v1491_v58, %v1184_v5 }
 0x225   : > { %v1155_v13 = vmax.f32 %v1123_v45, 0.0  ;;  %v892_v41 = vpop.xlane.xlu0 %891  ;;  %v1503_v30 = vmul.f32 %v3847_v24, %v3796_v62  ;;  %vm1499_vm5 = vweird.f32 %v3801_v42  ;;  %v1075_v32 = vmul.f32 %v3838_v57, %v3838_v57  ;;  %1902 = vmatmul.bf16.gmra.mxu1 %v1798_v21 }
 0x226   : > { %v993_v59 = vpop.xlane.xlu2 %992  ;;  %vm1498_vm6 = vweird.f32 %v3731_v47  ;;  %v1671_v17 = vpack.c.bf16 %v1639_v2, %v1639_v2  ;;  %v2360_v11 = vpack.c.bf16 %v1639_v2, %v1638_v60  ;;  %v1331_v28 = vsel %vm3859_vm4, %v3684_v0, %v1327_v49 }
 0x227   : > { %v3869_v27 = vadd.f32 1e-05, %v1155_v13  ;;  %v3871_v63 = vpop.eup %2542  ;;  %v1504_v51 = vmul.f32 %v3847_v24, %v1503_v30  ;;  %v894_v55 = vpop.xlane.xlu1 %893  ;;  %v1496_v8 = vsub.f32 1.5, %v1495_v56  ;;  %v1171_v54 = vsub.f32 %v3105_v31, %v3838_v57  ;;  %vm3933_vm12 = vmor %vm1498_vm6, %vm1499_vm5  ;;  %v4298_v31 = vld [vmem:[#allocation5_spill] sm:$0xff] }
 0x228   : > { %v1343_v5 = vmul.f32 %v3871_v63, %v3814_v7  ;;  %vm1348_vm8 = vweird.f32 %v3814_v7  ;;  %2420 = vst [vmem:[%s3294_s25 + $0x60] sm:$0xff] %v2360_v11   ;;  %v1786_v0 = vunpack.c.l.b16 %v1670_v12  ;;  %v1787_v26 = vunpack.c.l.b16 %v1671_v17 }
 0x229   : > { %2544 = vrsqrt.f32 %v3869_v27  ;;  %v3894_v23 = vmul.f32 %v3010_v48, %v892_v41  ;;  %v1043_v45 = vmul.f32 %v993_v59, %v3010_v48  ;;  %v3899_v16 = vmul.f32 %v3010_v48, %v894_v55 }
 0x22a   : > { %v1344_v20 = vmul.f32 %v3871_v63, %v1343_v5  ;;  %v1341_v43 = vsel %vm3887_vm7, %v3721_v35, %v1337_v1  ;;  %v1552_v49 = vmul.f32 %v1331_v28, %v1168_v36  ;;  %v3908_v58 = vmul.f32 %v3749_v39, %v1568_v15 }
 0x22b   : > { %v1505_v9 = vmul.f32 0.5, %v1504_v51  ;;  %v1806_v60 = vpack.c.b16 %v1787_v26, %v1786_v0  ;;  %v3912_v56 = vmul.f32 %v3010_v48, %v3811_v3  ;;  %v1497_v13 = vmul.f32 %v3801_v42, %v1496_v8 }
 0x22c   : > { %vm1509_vm9 = vweird.f32 %v3847_v24  ;;  %v1345_v21 = vmul.f32 0.5, %v1344_v20  ;;  %v1092_v35 = vmul.f32 %v3894_v23, %v3894_v23  ;;  %v1107_v41 = vsub.f32 %v1043_v45, %v1075_v32 }
 0x22d   : > { %v1029_v37 = vpop.xlane.xlu0 %1028  ;;  %1942 = vmatmul.bf16.gmra.mxu3 %v1806_v60  ;;  %v1093_v36 = vmul.f32 %v3899_v16, %v3899_v16  ;;  %v1553_v1 = vmul.f32 %v1341_v43, %v1169_v52  ;;  %vm1508_vm10 = vweird.f32 %v3796_v62  ;;  %vm1349_vm11 = vweird.f32 %v3871_v63 }
 0x22e   : > { %v1027_v50 = vpop.xlane.xlu2 %1026  ;;  %v1061_v59 = vmul.f32 %v1029_v37, %v3010_v48  ;;  %v1346_v2 = vsub.f32 1.5, %v1345_v21  ;;  %v1139_v12 = vmax.f32 %v1107_v41, 0.0  ;;  %v1588_v25 = vmul.f32 %v3749_v39, %v1552_v49  ;;  %vm3949_vm13 = vmor %vm1348_vm8, %vm1349_vm11 }
 0x22f   : > { %v1060_v3 = vmul.f32 %v1027_v50, %v3010_v48  ;;  %v2545_v30 = vpop.eup %2544  ;;  %v1506_v15 = vsub.f32 1.5, %v1505_v9  ;;  %v1589_v11 = vmul.f32 %v3749_v39, %v1553_v1  ;;  %v1501_v10 = vsel %vm3933_vm12, %v3801_v42, %v1497_v13  ;;  %vm3979_vm0 = vmor %vm1508_vm10, %vm1509_vm9 }
 0x230   : > { %v1513_v32 = vmul.f32 %v2545_v30, %v3869_v27  ;;  %v1125_v51 = vsub.f32 %v1061_v59, %v1093_v36  ;;  %v1347_v18 = vmul.f32 %v3871_v63, %v1346_v2  ;;  %v3938_v52 = vadd.f32 1e-05, %v1139_v12 }
 0x231   : > { %v1124_v17 = vsub.f32 %v1060_v3, %v1092_v35  ;;  %v1624_v55 = vadd.f32 %v3779_v61, %v1588_v25  ;;  %vm1518_vm14 = vweird.f32 %v3869_v27  ;;  %v1076_v0 = vmul.f32 %v3912_v56, %v3912_v56 }
 0x232   : > { %v1514_v28 = vmul.f32 %v2545_v30, %v1513_v32  ;;  %v1157_v8 = vmax.f32 %v1125_v51, 0.0  ;;  %2546 = vrsqrt.f32 %v3938_v52  ;;  %v1625_v26 = vadd.f32 %v3779_v61, %v1589_v11 }
 0x233   : > { %v1156_v5 = vmax.f32 %v1124_v17, 0.0  ;;  %v1351_v42 = vsel %vm3949_vm13, %v3871_v63, %v1347_v18  ;;  %v1656_v43 = vpack.c.bf16 %v1624_v55, %v1624_v55  ;;  %v1569_v21 = vmul.f32 %v1501_v10, %v1185_v33  ;;  %v997_v63 = vpop.xlane.xlu1 %996 }
 0x234   : > { %v1515_v45 = vmul.f32 0.5, %v1514_v28  ;;  %v3961_v7 = vadd.f32 1e-05, %v1157_v8  ;;  %v1657_v49 = vpack.c.bf16 %v1625_v26, %v1625_v26  ;;  %v2325_v9 = vpack.c.bf16 %v1625_v26, %v1624_v55 }
 0x235   : > { %v3963_v20 = vadd.f32 1e-05, %v1156_v5  ;;  %v995_v60 = vpop.xlane.xlu0 %994  ;;  %v1507_v35 = vmul.f32 %v3847_v24, %v1506_v15  ;;  %vm1519_vm15 = vweird.f32 %v2545_v30  ;;  %v1554_v37 = vmul.f32 %v1351_v42, %v1170_v29 }
 0x236   : > { %v862_v13 = vpop.xlane.xlu2 %861  ;;  %v1516_v41 = vsub.f32 1.5, %v1515_v45  ;;  %2548 = vrsqrt.f32 %v3961_v7  ;;  %2413 = vst [vmem:[%s3294_s25 + $0x28] sm:$0xff] %v2325_v9   ;;  %v1772_v50 = vunpack.c.l.b16 %v1656_v43  ;;  %v1773_v36 = vunpack.c.l.b16 %v1657_v49  ;;  %vm1520_vm1 = vmor %vm1518_vm14, %vm1519_vm15  ;;  %v4034_v43 = vld [vmem:[%s4237_s7] ss:$0 sm:$0xff] }
 0x237   : > { %2550 = vrsqrt.f32 %v3963_v20  ;;  %v1044_v33 = vmul.f32 %v995_v60, %v3010_v48  ;;  %v3985_v59 = vmul.f32 %v3010_v48, %v862_v13  ;;  %v1605_v53 = vmul.f32 %v3749_v39, %v1569_v21 }
 0x238   : > { %v1517_v14 = vmul.f32 %v2545_v30, %v1516_v41  ;;  %v3988_v38 = vpop.eup %2546  ;;  %v1187_v29 = vsub.f32 %v3067_v40, %v3806_v19  ;;  %v1799_v62 = vpack.c.b16 %v1773_v36, %v1772_v50  ;;  %v1045_v3 = vmul.f32 %v997_v63, %v3010_v48 }
 0x239   : > { %v1640_v1 = vadd.f32 %v3779_v61, %v3908_v58  ;;  %v1353_v12 = vmul.f32 %v3988_v38, %v3938_v52  ;;  %v1108_v25 = vsub.f32 %v1044_v33, %v1076_v0  ;;  %v1511_v15 = vsel %vm3979_vm0, %v3847_v24, %v1507_v35 }
 0x23a   : > { %v1521_v2 = vsel %vm1520_vm1, %v2545_v30, %v1517_v14  ;;  %vm1358_vm2 = vweird.f32 %v3938_v52  ;;  %1907 = vmatmul.bf16.gmra.mxu1 %v1799_v62  ;;  %v1077_v19 = vmul.f32 %v3985_v59, %v3985_v59  ;;  %v1641_v48 = vadd.f32 %v3779_v61, %v1605_v53 }
 0x23b   : > { %v1571_v40 = vmul.f32 %v1521_v2, %v1187_v29  ;;  %v1590_v58 = vmul.f32 %v3749_v39, %v1554_v37  ;;  %v1354_v30 = vmul.f32 %v3988_v38, %v1353_v12  ;;  %v1140_v32 = vmax.f32 %v1108_v25, 0.0 }
 0x23c   : > { %v4007_v27 = vpop.eup %2548  ;;  %vm1963_vm3 = vcmask 64512   ;;  %vm1538_vm4 = vweird.f32 %v3961_v7  ;;  %v1109_v17 = vsub.f32 %v1045_v3, %v1077_v19  ;;  %v1672_v46 = vpack.c.bf16 %v1640_v1, %v1640_v1  ;;  %v4299_v3 = vld [vmem:[#allocation6_spill] sm:$0xff] }
 0x23d   : > { %v4011_v51 = vpop.eup %2550  ;;  %v1533_v24 = vmul.f32 %v4007_v27, %v3961_v7  ;;  %v1570_v18 = vmul.f32 %v1511_v15, %v1186_v34  ;;  %v1607_v11 = vmul.f32 %v3749_v39, %v1571_v40  ;;  %v1355_v55 = vmul.f32 0.5, %v1354_v30 }
 0x23e   : > { %v1523_v28 = vmul.f32 %v4011_v51, %v3963_v20  ;;  %v4022_v8 = vadd.f32 1e-05, %v1140_v32  ;;  %v1141_v10 = vmax.f32 %v1109_v17, 0.0  ;;  %v1673_v47 = vpack.c.bf16 %v1641_v48, %v1641_v48 }
 0x23f   : > { %v1534_v5 = vmul.f32 %v4007_v27, %v1533_v24  ;;  %v2365_v0 = vpack.c.bf16 %v1641_v48, %v1640_v1  ;;  %v1356_v26 = vsub.f32 1.5, %v1355_v55  ;;  %vm1359_vm5 = vweird.f32 %v3988_v38 }
 0x240   : > { %v1524_v22 = vmul.f32 %v4011_v51, %v1523_v28  ;;  %2552 = vrsqrt.f32 %v4022_v8  ;;  %v4028_v34 = vadd.f32 1e-05, %v1141_v10  ;;  %v1788_v42 = vunpack.c.l.b16 %v1672_v46  ;;  %vm1360_vm6 = vmor %vm1358_vm2, %vm1359_vm5 }
 0x241   : > { %v1535_v6 = vmul.f32 0.5, %v1534_v5  ;;  %2421 = vst [vmem:[%s3294_s25 + $0x68] sm:$0xff] %v2365_v0   ;;  %v1789_v45 = vunpack.c.l.b16 %v1673_v47  ;;  %v1357_v49 = vmul.f32 %v3988_v38, %v1356_v26  ;;  %v1606_v60 = vmul.f32 %v3749_v39, %v1570_v18 }
 0x242   : > { %v1525_v9 = vmul.f32 0.5, %v1524_v22  ;;  %v1643_v13 = vadd.f32 %v3779_v61, %v1607_v11  ;;  %vm1539_vm7 = vweird.f32 %v4007_v27  ;;  %2554 = vrsqrt.f32 %v4028_v34  ;;  %v1883_v63 = vpop.f32.mrf.mxu1 }
 0x243   : > { %v1536_v21 = vsub.f32 1.5, %v1535_v6  ;;  %v1807_v35 = vpack.c.b16 %v1789_v45, %v1788_v42  ;;  %vm1529_vm8 = vweird.f32 %v4011_v51  ;;  %v1642_v37 = vadd.f32 %v3779_v61, %v1606_v60  ;;  %vm4062_vm9 = vmor %vm1538_vm4, %vm1539_vm7 }
 0x244   : > { %v1526_v41 = vsub.f32 1.5, %v1525_v9  ;;  %v1361_v52 = vsel %vm1360_vm6, %v3988_v38, %v1357_v49  ;;  %v1884_v36 = vadd.f32 %v4034_v43, %v1883_v63  ;;  %v1626_v14 = vadd.f32 %v3779_v61, %v1590_v58 }
 0x245   : > { %v1537_v50 = vmul.f32 %v4007_v27, %v1536_v21  ;;  %1947 = vmatmul.bf16.gmra.mxu3 %v1807_v35  ;;  %v1555_v4 = vmul.f32 %v1361_v52, %v1171_v54  ;;  %vm1528_vm10 = vweird.f32 %v3963_v20  ;;  %v1675_v29 = vpack.c.bf16 %v1643_v13, %v1643_v13 }
 0x246   : > { %v2553_v33 = vpop.eup %2552  ;;  %v1527_v38 = vmul.f32 %v4011_v51, %v1526_v41  ;;  %v2370_v62 = vpack.c.bf16 %v1643_v13, %v1642_v37  ;;  %v1188_v57 = vsub.f32 %v4298_v31, %v3894_v23  ;;  %vm1530_vm11 = vmor %vm1528_vm10, %vm1529_vm8  ;;  %1964 = vst.msk [vmem:[%s4048_s24] sm:$0xff] %vm1963_vm3, %v1884_v36  ;;  %v1189_v1 = vsub.f32 %v4299_v3, %v3899_v16  ;;  %v4300_v13 = vld [vmem:[#allocation7_spill] sm:$0xff] }
 0x247   : > { %v1363_v54 = vmul.f32 %v2553_v33, %v4022_v8  ;;  %v1591_v7 = vmul.f32 %v3749_v39, %v1555_v4  ;;  %v1658_v2 = vpack.c.bf16 %v1626_v14, %v1626_v14  ;;  %v1541_v23 = vsel %vm4062_vm9, %v4007_v27, %v1537_v50 }
 0x248   : > { %2422 = vst [vmem:[%s3294_s25 + $0x70] sm:$0xff] %v2370_v62   ;;  %v1531_v20 = vsel %vm1530_vm11, %v4011_v51, %v1527_v38  ;;  %v2555_v12 = vpop.eup %2554  ;;  %v1674_v48 = vpack.c.bf16 %v1642_v37, %v1642_v37  ;;  %v1791_v58 = vunpack.c.l.b16 %v1675_v29  ;;  %v1573_v30 = vmul.f32 %v1541_v23, %v1189_v1 }
 0x249   : > { %v1364_v25 = vmul.f32 %v2553_v33, %v1363_v54  ;;  %v1627_v15 = vadd.f32 %v3779_v61, %v1591_v7  ;;  %v1572_v40 = vmul.f32 %v1531_v20, %v1188_v57  ;;  %v1373_v19 = vmul.f32 %v2555_v12, %v4028_v34 }
 0x24a   : > { %vm1369_vm12 = vweird.f32 %v2553_v33  ;;  %v1885_v27 = vpop.f32.mrf.mxu1  ;;  %v1774_v46 = vunpack.c.l.b16 %v1658_v2  ;;  %v1609_v18 = vmul.f32 %v3749_v39, %v1573_v30  ;;  %vm1368_vm13 = vweird.f32 %v4022_v8 }
 0x24b   : > { %v1365_v16 = vmul.f32 0.5, %v1364_v25  ;;  %v1659_v32 = vpack.c.bf16 %v1627_v15, %v1627_v15  ;;  %v2330_v24 = vpack.c.bf16 %v1627_v15, %v1626_v14  ;;  %v1608_v51 = vmul.f32 %v3749_v39, %v1572_v40  ;;  %vm1370_vm14 = vmor %vm1368_vm13, %vm1369_vm12 }
 0x24c   : > { %v1374_v17 = vmul.f32 %v2555_v12, %v1373_v19  ;;  %v1886_v55 = vadd.f32 %v4034_v43, %v1885_v27  ;;  %v1645_v47 = vadd.f32 %v3779_v61, %v1609_v18  ;;  %v1790_v26 = vunpack.c.l.b16 %v1674_v48 }
 0x24d   : > { %v1366_v11 = vsub.f32 1.5, %v1365_v16  ;;  %2414 = vst [vmem:[%s3294_s25 + $0x30] sm:$0xff] %v2330_v24   ;;  %v1775_v28 = vunpack.c.l.b16 %v1659_v32  ;;  %v1644_v5 = vadd.f32 %v3779_v61, %v1608_v51  ;;  %v1172_v6 = vsub.f32 %v3114_v44, %v3912_v56 }
 0x24e   : > { %v1375_v10 = vmul.f32 0.5, %v1374_v17  ;;  %1965 = vst.msk [vmem:[%s4048_s24 + $0x8] sm:$0xff] %vm1963_vm3, %v1886_v55  ;;  %vm1379_vm15 = vweird.f32 %v2555_v12  ;;  %v1808_v49 = vpack.c.b16 %v1791_v58, %v1790_v26  ;;  %vm1378_vm0 = vweird.f32 %v4028_v34 }
 0x24f   : > { %v1367_v0 = vmul.f32 %v2553_v33, %v1366_v11  ;;  %v1800_v22 = vpack.c.b16 %v1775_v28, %v1774_v46  ;;  %v2375_v45 = vpack.c.bf16 %v1645_v47, %v1644_v5  ;;  %v1173_v21 = vsub.f32 %v4300_v13, %v3985_v59  ;;  %vm1380_vm1 = vmor %vm1378_vm0, %vm1379_vm15 }
 0x250   : > { %v1376_v42 = vsub.f32 1.5, %v1375_v10  ;;  %v1676_v50 = vpack.c.bf16 %v1644_v5, %v1644_v5  ;;  %v1677_v36 = vpack.c.bf16 %v1645_v47, %v1645_v47 }
 0x251   : > { %1912 = vmatmul.bf16.gmra.mxu1 %v1800_v22  ;;  %v1371_v9 = vsel %vm1370_vm14, %v2553_v33, %v1367_v0  ;;  %2423 = vst [vmem:[%s3294_s25 + $0x78] sm:$0xff] %v2375_v45  }
 0x252   : > { %v1377_v60 = vmul.f32 %v2555_v12, %v1376_v42  ;;  %v1556_v8 = vmul.f32 %v1371_v9, %v1172_v6  ;;  %v1792_v29 = vunpack.c.l.b16 %v1676_v50 }
 0x254   : > { %v1381_v44 = vsel %vm1380_vm1, %v2555_v12, %v1377_v60  ;;  %v1592_v56 = vmul.f32 %v3749_v39, %v1556_v8  ;;  %v1923_v41 = vpop.f32.mrf.mxu3 }
 0x255   : > { %v1557_v35 = vmul.f32 %v1381_v44, %v1173_v21  ;;  %1952 = vmatmul.bf16.gmra.mxu3 %v1808_v49  ;;  %v1924_v52 = vadd.f32 %v4034_v43, %v1923_v41 }
 0x256   : > { %v1628_v63 = vadd.f32 %v3779_v61, %v1592_v56 }
 0x257   : > { %v1593_v37 = vmul.f32 %v3749_v39, %v1557_v35  ;;  %1980 = vst.msk [vmem:[%s4048_s24 + $0x80] sm:$0xff] %vm1963_vm3, %v1924_v52  ;;  %v1793_v39 = vunpack.c.l.b16 %v1677_v36 }
 0x258   : > { %v1660_v59 = vpack.c.bf16 %v1628_v63, %v1628_v63 }
 0x259   : > { %v1629_v34 = vadd.f32 %v3779_v61, %v1593_v37  ;;  %v1809_v61 = vpack.c.b16 %v1793_v39, %v1792_v29 }
 0x25a   : > { %v1776_v33 = vunpack.c.l.b16 %v1660_v59 }
 0x25b   : > { %v1661_v4 = vpack.c.bf16 %v1629_v34, %v1629_v34  ;;  %v2335_v14 = vpack.c.bf16 %v1629_v34, %v1628_v63 }
 0x25c   : > { %v1925_v38 = vpop.f32.mrf.mxu3 }
 0x25d   : > { %2415 = vst [vmem:[%s3294_s25 + $0x38] sm:$0xff] %v2335_v14   ;;  %v1777_v53 = vunpack.c.l.b16 %v1661_v4  ;;  %v1926_v62 = vadd.f32 %v4034_v43, %v1925_v38 }
 0x25f   : > { %v1801_v31 = vpack.c.b16 %v1777_v53, %v1776_v33  ;;  %1981 = vst.msk [vmem:[%s4048_s24 + $0x88] sm:$0xff] %vm1963_vm3, %v1926_v62 }
 0x261   : > { %1917 = vmatmul.bf16.gmra.mxu1 %v1801_v31  ;;  %v1888_v57 = vpop.f32.mrf.mxu1 }
 0x262   : > { %v1889_v54 = vadd.f32 %v4034_v43, %v1888_v57 }
 0x264   : > { %v1928_v7 = vpop.f32.mrf.mxu3  ;;  %1966 = vst.msk [vmem:[%s4048_s24 + $0x10] sm:$0xff] %vm1963_vm3, %v1889_v54 }
 0x265   : > { %1957 = vmatmul.bf16.gmra.mxu3 %v1809_v61  ;;  %v1929_v3 = vadd.f32 %v4034_v43, %v1928_v7 }
 0x267   : > { %1982 = vst.msk [vmem:[%s4048_s24 + $0x90] sm:$0xff] %vm1963_vm3, %v1929_v3 }
 0x269   : > { %v1890_v1 = vpop.f32.mrf.mxu1 }
 0x26a   : > { %v1891_v2 = vadd.f32 %v4034_v43, %v1890_v1 }
 0x26c   : > { %v1930_v20 = vpop.f32.mrf.mxu3  ;;  %1967 = vst.msk [vmem:[%s4048_s24 + $0x18] sm:$0xff] %vm1963_vm3, %v1891_v2 }
 0x26d   : > { %v1931_v23 = vadd.f32 %v4034_v43, %v1930_v20 }
 0x26f   : > { %1983 = vst.msk [vmem:[%s4048_s24 + $0x98] sm:$0xff] %vm1963_vm3, %v1931_v23 }
 0x271   : > { %v1893_v12 = vpop.f32.mrf.mxu1 }
 0x272   : > { %v1894_v25 = vadd.f32 %v4034_v43, %v1893_v12 }
 0x274   : > { %1968 = vst.msk [vmem:[%s4048_s24 + $0x20] sm:$0xff] %vm1963_vm3, %v1894_v25 }
 0x275   : > { %2585 = shalt.err (!%p2582_p3)
}
 0x276   : > { %s2624_s23 = smov 64   ;;  %s2625_s29 = smov 4  }
 0x277   : > { %2440 = dma.vmem_to_hbm [thread:$0]  (%p2714_p5), %s2015_s26, 2048, %s2017_s14, %s1997_s16, %s2624_s23, %s2624_s23, %s2625_s29  }
 0x279   : > { %v1895_v15 = vpop.f32.mrf.mxu1 }
 0x27a   : > { %v1896_v40 = vadd.f32 %v4034_v43, %v1895_v15 }
 0x27c   : > { %1969 = vst.msk [vmem:[%s4048_s24 + $0x28] sm:$0xff] %vm1963_vm3, %v1896_v40 }
 0x27e   : > { %v1933_v19 = vpop.f32.mrf.mxu3 }
 0x27f   : > { %v1934_v48 = vadd.f32 %v4034_v43, %v1933_v19 }
 0x281   : > { %1984 = vst.msk [vmem:[%s4048_s24 + $0xa0] sm:$0xff] %vm1963_vm3, %v1934_v48 }
 0x284   : > { %v1898_v58 = vpop.f32.mrf.mxu1 }
 0x285   : > { %v1899_v30 = vadd.f32 %v4034_v43, %v1898_v58 }
 0x286   : > { %v1935_v16 = vpop.f32.mrf.mxu3 }
 0x287   : > { %1970 = vst.msk [vmem:[%s4048_s24 + $0x30] sm:$0xff] %vm1963_vm3, %v1899_v30  ;;  %v1936_v32 = vadd.f32 %v4034_v43, %v1935_v16 }
 0x289   : > { %1985 = vst.msk [vmem:[%s4048_s24 + $0xa8] sm:$0xff] %vm1963_vm3, %v1936_v32 }
 0x28c   : > { %v1900_v24 = vpop.f32.mrf.mxu1 }
 0x28d   : > { %v1901_v51 = vadd.f32 %v4034_v43, %v1900_v24 }
 0x28f   : > { %1971 = vst.msk [vmem:[%s4048_s24 + $0x38] sm:$0xff] %vm1963_vm3, %v1901_v51 }
 0x298   : > { %v1938_v17 = vpop.f32.mrf.mxu3 }
 0x299   : > { %v1939_v27 = vadd.f32 %v4034_v43, %v1938_v17 }
 0x29b   : > { %1986 = vst.msk [vmem:[%s4048_s24 + $0xb0] sm:$0xff] %vm1963_vm3, %v1939_v27 }
 0x2a0   : > { %v1940_v46 = vpop.f32.mrf.mxu3 }
 0x2a1   : > { %v1941_v18 = vadd.f32 %v4034_v43, %v1940_v46 }
 0x2a2   : > { %v1903_v11 = vpop.f32.mrf.mxu1 }
 0x2a3   : > { %v1904_v55 = vadd.f32 %v4034_v43, %v1903_v11  ;;  %1987 = vst.msk [vmem:[%s4048_s24 + $0xb8] sm:$0xff] %vm1963_vm3, %v1941_v18 }
 0x2a5   : > { %1972 = vst.msk [vmem:[%s4048_s24 + $0x40] sm:$0xff] %vm1963_vm3, %v1904_v55 }
 0x2aa   : > { %v1905_v28 = vpop.f32.mrf.mxu1 }
 0x2ab   : > { %v1906_v5 = vadd.f32 %v4034_v43, %v1905_v28 }
 0x2ad   : > { %1973 = vst.msk [vmem:[%s4048_s24 + $0x48] sm:$0xff] %vm1963_vm3, %v1906_v5 }
 0x2b0   : > { %v1943_v10 = vpop.f32.mrf.mxu3 }
 0x2b1   : > { %v1944_v47 = vadd.f32 %v4034_v43, %v1943_v10 }
 0x2b3   : > { %1988 = vst.msk [vmem:[%s4048_s24 + $0xc0] sm:$0xff] %vm1963_vm3, %v1944_v47 }
 0x2b7   : > { %v1908_v0 = vpop.f32.mrf.mxu1 }
 0x2b8   : > { %v1945_v26 = vpop.f32.mrf.mxu3  ;;  %v1909_v22 = vadd.f32 %v4034_v43, %v1908_v0 }
 0x2b9   : > { %v1946_v6 = vadd.f32 %v4034_v43, %v1945_v26 }
 0x2ba   : > { %1974 = vst.msk [vmem:[%s4048_s24 + $0x50] sm:$0xff] %vm1963_vm3, %v1909_v22 }
 0x2bb   : > { %1989 = vst.msk [vmem:[%s4048_s24 + $0xc8] sm:$0xff] %vm1963_vm3, %v1946_v6 }
 0x2bf   : > { %v1910_v42 = vpop.f32.mrf.mxu1 }
 0x2c0   : > { %v1911_v45 = vadd.f32 %v4034_v43, %v1910_v42 }
 0x2c2   : > { %1975 = vst.msk [vmem:[%s4048_s24 + $0x58] sm:$0xff] %vm1963_vm3, %v1911_v45 }
 0x2c8   : > { %v1948_v49 = vpop.f32.mrf.mxu3 }
 0x2c9   : > { %v1949_v9 = vadd.f32 %v4034_v43, %v1948_v49 }
 0x2cb   : > { %1990 = vst.msk [vmem:[%s4048_s24 + $0xd0] sm:$0xff] %vm1963_vm3, %v1949_v9 }
 0x2ce   : > { %v1913_v60 = vpop.f32.mrf.mxu1 }
 0x2cf   : > { %v1914_v8 = vadd.f32 %v4034_v43, %v1913_v60 }
 0x2d0   : > { %v1950_v13 = vpop.f32.mrf.mxu3 }
 0x2d1   : > { %v1951_v21 = vadd.f32 %v4034_v43, %v1950_v13  ;;  %1976 = vst.msk [vmem:[%s4048_s24 + $0x60] sm:$0xff] %vm1963_vm3, %v1914_v8 }
 0x2d3   : > { %1991 = vst.msk [vmem:[%s4048_s24 + $0xd8] sm:$0xff] %vm1963_vm3, %v1951_v21 }
 0x2d6   : > { %v1915_v44 = vpop.f32.mrf.mxu1 }
 0x2d7   : > { %v1916_v56 = vadd.f32 %v4034_v43, %v1915_v44 }
 0x2d8   : > { %v1953_v35 = vpop.f32.mrf.mxu3 }
 0x2d9   : > { %v1954_v41 = vadd.f32 %v4034_v43, %v1953_v35  ;;  %1977 = vst.msk [vmem:[%s4048_s24 + $0x68] sm:$0xff] %vm1963_vm3, %v1916_v56 }
 0x2db   : > { %1992 = vst.msk [vmem:[%s4048_s24 + $0xe0] sm:$0xff] %vm1963_vm3, %v1954_v41 }
 0x2de   : > { %v1918_v63 = vpop.f32.mrf.mxu1 }
 0x2df   : > { %v1919_v37 = vadd.f32 %v4034_v43, %v1918_v63 }
 0x2e0   : > { %v1955_v52 = vpop.f32.mrf.mxu3 }
 0x2e1   : > { %v1956_v34 = vadd.f32 %v4034_v43, %v1955_v52  ;;  %1978 = vst.msk [vmem:[%s4048_s24 + $0x70] sm:$0xff] %vm1963_vm3, %v1919_v37 }
 0x2e3   : > { %1993 = vst.msk [vmem:[%s4048_s24 + $0xe8] sm:$0xff] %vm1963_vm3, %v1956_v34 }
 0x2e6   : > { %v1920_v59 = vpop.f32.mrf.mxu1 }
 0x2e7   : > { %v1921_v50 = vadd.f32 %v4034_v43, %v1920_v59 }
 0x2e8   : > { %v1958_v36 = vpop.f32.mrf.mxu3 }
 0x2e9   : > { %v1959_v4 = vadd.f32 %v4034_v43, %v1958_v36  ;;  %1979 = vst.msk [vmem:[%s4048_s24 + $0x78] sm:$0xff] %vm1963_vm3, %v1921_v50 }
 0x2eb   : > { %1994 = vst.msk [vmem:[%s4048_s24 + $0xf0] sm:$0xff] %vm1963_vm3, %v1959_v4 }
 0x2f0   : > { %v1960_v14 = vpop.f32.mrf.mxu3 }
 0x2f1   : > { %v1961_v33 = vadd.f32 %v4034_v43, %v1960_v14 }
 0x2f3   : > { %1995 = vst.msk [vmem:[%s4048_s24 + $0xf8] sm:$0xff] %vm1963_vm3, %v1961_v33 }
 0x2f4 PF: > { %p2446_p4 = scmp.ge.s32.totalorder %s2620_s12, 2  ;;  %s2035_s19 = sand.u32 1, %s2608_s30  }
 0x2f5   : > { %s2036_s26 = scalar_lea.sflag [#allocation3], %s2035_s19 }
 0x2f6   : > { %p2443_p5 = pnand %p2446_p4, %p2718_p6 }
 0x2f8   : > { %p2444_p7 = pneg %p2443_p5 }
 0x2fa   : > { %2603 = dma.done.wait (%p2444_p7), %s2036_s26, 2048  }
 0x2fb   : > { %2605 = vsyncadd (%p2444_p7), %s2036_s26, 4294965248  ;;  %p20_p8 = scmp.ge.s32.totalorder %s2701_s15, 4   ;;  %s4301_s30 = smov %s2612_s10 }
 0x2fc   : > { %s4302_s10 = smov %s2616_s11  ;;  %s4303_s11 = smov %s2712_s18 }
 0x2fd   : > { %s4304_s12 = smov %s2701_s15  ;;  %22 = sbr.rel (!%p20_p8) target bundleno = 3 (0x3), region = 102 }
 0x302   :  { %2050 = vsyncpa [#allocation3], 1 }
 0x303   :  { %2052 = vsyncpa [#allocation3 + $0x1], 1 }

</bundles_post_ra>
